<compile_context>
chip_gen: v6e
topology: v6e:2x2x1
jax: 0.10.0
libtpu: 0.0.40
codegen_flags: <defaults>
</compile_context>

<pallas_src>
import functools

import jax
import jax.numpy as jnp
from jax.experimental import pallas as pl
from jax.experimental.pallas import tpu as pltpu

LN_EPS = 1e-5                      # config.layer_norm_epsilon

# Rows of the packed per-layer (n_layers, 8, D) parameter slab.
(ROW_LN1_W, ROW_LN1_B, ROW_LN2_W, ROW_LN2_B,
 ROW_OUT_B, ROW_PROJ_B, ROW_OUT_SCALE, ROW_PROJ_SCALE) = range(8)
# Rows of the packed per-layer (n_layers, 2, FF) parameter slab.
FFROW_FC_B, FFROW_FC_SCALE = range(2)


def _vmem_limit_bytes():
    """Generation-aware VMEM limit: ~3/4 of physical VMEM, capped at 112 MiB."""
    try:
        phys = int(pltpu.get_tpu_info().vmem_capacity_bytes)
    except Exception:
        phys = 64 * 1024 * 1024          # conservative (v7x-sized) fallback
    return min(phys * 3 // 4, 112 * 1024 * 1024)


def _round_up(x, m):
    return ((x + m - 1) // m) * m


def _quantize_int8(w):
    """Symmetric per-output-column int8 quantization of (..., in, out) weights.

    Dequant (W = W_q * scale, scale per output column) commutes exactly through
    x @ W, so the kernels apply `scale` as a post-matmul column scale.
    """
    amax = jnp.max(jnp.abs(w), axis=-2, keepdims=True)
    scale = jnp.maximum(amax, 1e-8) / 127.0
    q = jnp.clip(jnp.round(w / scale), -127, 127).astype(jnp.int8)
    return q, scale.astype(jnp.float32)


def _layernorm(x, w, b):
    mu = jnp.mean(x, axis=-1, keepdims=True)
    var = jnp.mean((x - mu) ** 2, axis=-1, keepdims=True)
    return (x - mu) * jax.lax.rsqrt(var + LN_EPS) * w + b


# --------------------------------------------------------------------------
# Transformer stack kernel: grid over layers, hidden state resident in o_ref.
# --------------------------------------------------------------------------
def gptneo_layers_kernel(len_ref,
                         hs_ref, lnf_ref, small_d_ref, small_ff_ref,
                         qkv_scale_ref, qkvw_ref, ow_ref, fcw_ref, pjw_ref,
                         o_ref, *, num_heads):
    layer = pl.program_id(0)
    last = pl.num_programs(0) - 1
    L, D = o_ref.shape
    H = num_heads
    hd = D // H

    @pl.when(layer == 0)
    def _():
        o_ref[...] = hs_ref[...]

    x = o_ref[...]                                   # (L, D) f32 residual

    # ---------------- attention block ----------------
    h = _layernorm(x, small_d_ref[ROW_LN1_W, :], small_d_ref[ROW_LN1_B, :])
    # fused QKV: one (L,D) x (D,3D) bf16 matmul (int8 weights cast in VMEM),
    # f32 accumulation; int8 dequant folded as a per-output-column post-scale.
    qkv = jnp.dot(h.astype(jnp.bfloat16), qkvw_ref[...].astype(jnp.bfloat16),
                  preferred_element_type=jnp.float32)
    qkv = qkv * qkv_scale_ref[...]                   # (L,3D) * (1,3D)

    # Head split via reshape + batched einsum (no per-head lane slicing/concat).
    q = qkv[:, 0 * D:1 * D].reshape(L, H, hd)
    k = qkv[:, 1 * D:2 * D].reshape(L, H, hd)
    v = qkv[:, 2 * D:3 * D].reshape(L, H, hd)

    qpos = jax.lax.broadcasted_iota(jnp.int32, (L, L), 0)
    kpos = jax.lax.broadcasted_iota(jnp.int32, (L, L), 1)
    # causal AND only attend to the first `actual_length` (non-pad) keys
    valid = (kpos <= qpos) & (kpos < len_ref[0])

    # GPT-Neo attention has NO 1/sqrt(head_dim) scaling; q/k kept in f32
    # (matches the HF upcast).  Scores stay in f32.
    s = jnp.einsum('qhd,khd->hqk', q, k,
                   preferred_element_type=jnp.float32)        # (H, L, L)
    s = jnp.where(valid[None, :, :], s, jnp.finfo(jnp.float32).min)
    m = jnp.max(s, axis=-1, keepdims=True)
    e = jnp.exp(s - m)
    p = e * pl.reciprocal(jnp.sum(e, axis=-1, keepdims=True), approx=True)
    ctx = jnp.einsum('hqk,khd->qhd', p, v,
                     preferred_element_type=jnp.float32)      # (L, H, hd)
    a = ctx.reshape(L, D)
    # NOTE: module fixes small L, so dense (H,L,L) scores fit; a flash-style
    # key-tiled online softmax is unnecessary here.

    attn_out = jnp.dot(a.astype(jnp.bfloat16), ow_ref[...].astype(jnp.bfloat16),
                       preferred_element_type=jnp.float32)
    attn_out = (attn_out * small_d_ref[ROW_OUT_SCALE, :]
                + small_d_ref[ROW_OUT_B, :])
    x = x + attn_out

    # ---------------- MLP block ----------------
    h2 = _layernorm(x, small_d_ref[ROW_LN2_W, :], small_d_ref[ROW_LN2_B, :])
    ff = jnp.dot(h2.astype(jnp.bfloat16), fcw_ref[...].astype(jnp.bfloat16),
                 preferred_element_type=jnp.float32)
    ff = ff * small_ff_ref[FFROW_FC_SCALE, :] + small_ff_ref[FFROW_FC_B, :]
    ff = jax.nn.gelu(ff, approximate=True)           # GPT-Neo "gelu_new"
    mlp_out = jnp.dot(ff.astype(jnp.bfloat16), pjw_ref[...].astype(jnp.bfloat16),
                      preferred_element_type=jnp.float32)
    mlp_out = (mlp_out * small_d_ref[ROW_PROJ_SCALE, :]
               + small_d_ref[ROW_PROJ_B, :])
    x = x + mlp_out

    o_ref[...] = x                                   # keep hidden resident

    @pl.when(layer == last)
    def _():                                         # fold ln_f into last step
        o_ref[...] = _layernorm(x, lnf_ref[0, :], lnf_ref[1, :])


def run_gptneo_layers(hidden, actual_len, params, vmem_limit):
    L, D = hidden.shape
    layers = params['layers']
    H = params['num_heads']
    n_layers = layers['qkvw'].shape[0]
    FF = layers['fcw'].shape[-1]
    hd = D // H

    per_layer = lambda l, alen: (l, 0, 0)
    fixed = lambda l, alen: (0, 0)

    in_specs = [
        pl.BlockSpec((L, D), fixed),                 # hidden (layer-0 init)
        pl.BlockSpec((2, D), fixed),                 # ln_f [w; b]
        pl.BlockSpec((None, 8, D), per_layer),       # packed D-wide per-layer params
        pl.BlockSpec((None, 2, FF), per_layer),      # packed FF-wide per-layer params
        pl.BlockSpec((None, 1, 3 * D), per_layer),   # qkv dequant scale
        pl.BlockSpec((None, D, 3 * D), per_layer),   # qkv weight (int8)
        pl.BlockSpec((None, D, D), per_layer),       # out-proj weight (int8)
        pl.BlockSpec((None, D, FF), per_layer),      # mlp fc weight (int8)
        pl.BlockSpec((None, FF, D), per_layer),      # mlp proj weight (int8)
    ]
    out_specs = pl.BlockSpec((L, D), fixed)

    flops_layer = (2 * L * D * 3 * D                 # QKV
                   + 4 * H * L * L * hd              # scores + PV
                   + 2 * L * D * D                   # out proj
                   + 4 * L * D * FF)                 # MLP
    bytes_layer = ((3 * D * D + D * D + 2 * D * FF)  # int8 weights
                   + (8 * D + 2 * FF + 3 * D) * 4)   # packed params + scales
    cost = pl.CostEstimate(
        flops=int(n_layers * flops_layer),
        transcendentals=int(n_layers * (H * L * L + L * FF)),
        bytes_accessed=int(n_layers * bytes_layer + 3 * L * D * 4),
    )

    kernel = functools.partial(gptneo_layers_kernel, num_heads=H)
    operands = (actual_len, hidden, params['lnf'],
                layers['small_d'], layers['small_ff'], layers['qkv_scale'],
                layers['qkvw'], layers['ow'], layers['fcw'], layers['pjw'])

    def build(aliases):
        return pl.pallas_call(
            kernel,
            out_shape=jax.ShapeDtypeStruct((L, D), jnp.float32),
            grid_spec=pltpu.PrefetchScalarGridSpec(
                num_scalar_prefetch=1,
                grid=(n_layers,),
                in_specs=in_specs,
                out_specs=out_specs,
            ),
            compiler_params=pltpu.CompilerParams(
                dimension_semantics=("arbitrary",),
                vmem_limit_bytes=vmem_limit),
            cost_estimate=cost,
            input_output_aliases=aliases,
        )

    try:
        # Donate the hidden-state buffer straight into the output.  Alias index
        # counts ALL flattened pallas_call operands (incl. the scalar-prefetch
        # arg), so `hidden` is input index 1.
        return build({1: 0})(*operands)
    except Exception:
        return build({})(*operands)


# --------------------------------------------------------------------------
# lm_head kernel, tiled over the vocab dimension.
# --------------------------------------------------------------------------
def lm_head_kernel(h_ref, w_ref, s_ref, o_ref):
    acc = jnp.dot(h_ref[...].astype(jnp.bfloat16),
                  w_ref[...].astype(jnp.bfloat16),
                  preferred_element_type=jnp.float32)
    o_ref[...] = acc * s_ref[...]                    # int8 dequant (per column)


def _pick_vocab_tile(V, D, L, vmem_limit):
    """Largest vocab tile (multiple of 128, <=16384) fitting the VMEM budget."""
    budget = int(vmem_limit * 0.7) - 4 * L * D
    per_col = 2 * (D + 4 * L + 4)    # dbl-buffered: int8 W col + f32 out col + scale
    t = max(budget // max(per_col, 1), 128)
    t = max((t // 128) * 128, 128)
    return min(t, 16384, _round_up(V, 128))


def run_lm_head(hidden, lm_w_q, lm_scale, vmem_limit):
    L, D = hidden.shape
    V = lm_w_q.shape[1]
    tile_v = _pick_vocab_tile(V, D, L, vmem_limit)
    # cdiv grid: the (possibly partial) last vocab tile is handled by Pallas'
    # masked boundary blocks, so arbitrary vocab sizes (e.g. 50257) work.
    grid = (pl.cdiv(V, tile_v),)

    cost = pl.CostEstimate(
        flops=2 * L * D * V,
        transcendentals=0,
        bytes_accessed=int(D * V + V * 4 + L * D * 4 + L * V * 4),
    )
    return pl.pallas_call(
        lm_head_kernel,
        out_shape=jax.ShapeDtypeStruct((L, V), jnp.float32),
        grid_spec=pltpu.PrefetchScalarGridSpec(
            num_scalar_prefetch=0,
            grid=grid,
            in_specs=[pl.BlockSpec((L, D), lambda j: (0, 0)),
                      pl.BlockSpec((D, tile_v), lambda j: (0, j)),
                      pl.BlockSpec((1, tile_v), lambda j: (0, j))],
            out_specs=pl.BlockSpec((L, tile_v), lambda j: (0, j)),
        ),
        compiler_params=pltpu.CompilerParams(
            dimension_semantics=("parallel",),
            vmem_limit_bytes=vmem_limit),
        cost_estimate=cost,
    )(hidden, lm_w_q, lm_scale)


# --------------------------------------------------------------------------
# Full forward (matches GPTNeoForCausalLM.forward for batch size 1).
# --------------------------------------------------------------------------
def gptneo_forward(input_ids, attention_mask, params):
    wte = params['wte']          # (V, D)
    wpe = params['wpe']          # (max_pos, D)

    position_ids = jnp.cumsum(attention_mask.astype(jnp.int32), axis=-1) - 1
    position_ids = jnp.where(attention_mask == 0, 1, position_ids)

    inputs_embeds = jnp.take(wte, input_ids, axis=0)          # (1, L, D)
    position_embeds = jnp.take(wpe, position_ids, axis=0)     # (1, L, D)
    hidden = (inputs_embeds + position_embeds)[0].astype(jnp.float32)

    actual_len = jnp.sum(attention_mask).astype(jnp.int32).reshape(1)

    vmem_limit = _vmem_limit_bytes()
    hidden = run_gptneo_layers(hidden, actual_len, params, vmem_limit)  # + ln_f
    logits = run_lm_head(hidden, params['lm_w_q'], params['lm_scale'],
                         vmem_limit)                           # (L, V)
    # NOTE: query rows beyond actual_len carry pad-token states (keys are
    # masked, queries are not) — identical to the naive PyTorch reference.
    return logits[None, :, :]                                  # (1, L, V)


def init_params(key, vocab, max_pos, D, FF, H, n_layers):
    def nrm(k, shape, scale=0.02):
        return scale * jax.random.normal(k, shape, dtype=jnp.float32)

    keys = jax.random.split(key, 4 + n_layers)
    qkvw, ow, ob, fcw, fcb, pjw, pjb = [], [], [], [], [], [], []
    for li in range(n_layers):
        lk = jax.random.split(keys[4 + li], 8)
        qw, kw, vw = nrm(lk[0], (D, D)), nrm(lk[1], (D, D)), nrm(lk[2], (D, D))
        qkvw.append(jnp.concatenate([qw, kw, vw], axis=1))    # fused (D, 3D)
        ow.append(nrm(lk[3], (D, D)))
        ob.append(jnp.zeros((1, D), jnp.float32))
        fcw.append(nrm(lk[4], (D, FF)))
        fcb.append(nrm(lk[5], (1, FF)))
        pjw.append(nrm(lk[6], (FF, D)))
        pjb.append(nrm(lk[7], (1, D)))

    qkvw, ow, fcw, pjw = map(jnp.stack, (qkvw, ow, fcw, pjw))
    ob, fcb, pjb = map(jnp.stack, (ob, fcb, pjb))

    # Weight-only int8 quantization; dequant is an exact per-column post-scale.
    qkvw_q, qkv_scale = _quantize_int8(qkvw)       # (nl,D,3D), (nl,1,3D)
    ow_q, ow_scale = _quantize_int8(ow)            # (nl,D,D),  (nl,1,D)
    fcw_q, fcw_scale = _quantize_int8(fcw)         # (nl,D,FF), (nl,1,FF)
    pjw_q, pjw_scale = _quantize_int8(pjw)         # (nl,FF,D), (nl,1,D)

    ones_d = jnp.ones((n_layers, 1, D), jnp.float32)
    zeros_d = jnp.zeros((n_layers, 1, D), jnp.float32)
    # Packed (n_layers, 8, D) slab; row order must match ROW_* constants.
    small_d = jnp.concatenate(
        [ones_d, zeros_d,            # ln1_w, ln1_b
         ones_d, zeros_d,            # ln2_w, ln2_b
         ob, pjb,                    # out_proj bias, mlp_proj bias
         ow_scale, pjw_scale],       # dequant scales
        axis=1)
    small_ff = jnp.concatenate([fcb, fcw_scale], axis=1)   # (n_layers, 2, FF)

    # lm_head: nn.Linear(D, vocab, bias=False), pre-transposed to (D, V).
    # (HF GPT-Neo ties lm_head to wte; set lm_w = wte.T at checkpoint load.)
    lm_w = nrm(keys[2], (D, vocab))
    lm_w_q, lm_scale = _quantize_int8(lm_w)

    layers = {
        'small_d': small_d,
        'small_ff': small_ff,
        'qkv_scale': qkv_scale,
        'qkvw': qkvw_q,
        'ow': ow_q,
        'fcw': fcw_q,
        'pjw': pjw_q,
    }
    return {
        'num_heads': H,
        'wte': nrm(keys[0], (vocab, D)),
        'wpe': nrm(keys[1], (max_pos, D)),
        'lnf': jnp.stack([jnp.ones((D,), jnp.float32),
                          jnp.zeros((D,), jnp.float32)]),      # (2, D)
        'lm_w_q': lm_w_q,
        'lm_scale': lm_scale,
        'layers': layers,
    }


if __name__ == "__main__":
    # small shapes consistent with the module (original hardcodes L=64, D=768, H=12)
    VOCAB, MAX_POS, D, H, L, N_LAYERS = 128, 16, 64, 4, 8, 2
    FF = 4 * D

    key = jax.random.PRNGKey(0)
    pkey, ikey = jax.random.split(key)
    params = init_params(pkey, VOCAB, MAX_POS, D, FF, H, N_LAYERS)

    input_ids = jax.random.randint(ikey, (1, L), 0, VOCAB, dtype=jnp.int32)
    # padding at the end -> actual_length = 6 (GPTNeo_layer only receives a length)
    attention_mask = jnp.array([[1, 1, 1, 1, 1, 1, 0, 0]], dtype=jnp.int32)

    logits = gptneo_forward(input_ids, attention_mask, params)
    jax.block_until_ready(logits)
    assert logits.shape == (1, L, VOCAB)
    assert bool(jnp.all(jnp.isfinite(logits)))
    print("KERNEL_OK")
</pallas_src>

<mosaic_0001>
module attributes {stable_mosaic.version = 11 : i64} {
  func.func @gptneo_layers_kernel(%arg0: i32, %arg1: memref<1xi32, #tpu.memory_space<smem>>, %arg2: memref<8x64xf32, #tpu.memory_space<vmem>>, %arg3: memref<2x64xf32, #tpu.memory_space<vmem>>, %arg4: memref<1x8x64xf32, #tpu.memory_space<vmem>>, %arg5: memref<1x2x256xf32, #tpu.memory_space<vmem>>, %arg6: memref<1x1x192xf32, #tpu.memory_space<vmem>>, %arg7: memref<1x64x192xi8, #tpu.memory_space<vmem>>, %arg8: memref<1x64x64xi8, #tpu.memory_space<vmem>>, %arg9: memref<1x64x256xi8, #tpu.memory_space<vmem>>, %arg10: memref<1x256x64xi8, #tpu.memory_space<vmem>>, %arg11: memref<8x64xf32, #tpu.memory_space<vmem>>) attributes {dimension_semantics = [#tpu.dimension_semantics<arbitrary>], iteration_bounds = array<i64: 2>, scalar_prefetch = 1 : i64, scratch_operands = 0 : i64, tpu.core_type = #tpu.core_type<tc>, window_params = [{pipeline_mode = #tpu.pipeline_mode<synchronous>, transform_indices = @transform_0, window_bounds = array<i64: 8, 64>}, {pipeline_mode = #tpu.pipeline_mode<synchronous>, transform_indices = @transform_1, window_bounds = array<i64: 2, 64>}, {transform_indices = @transform_2, window_bounds = array<i64: 1, 8, 64>}, {transform_indices = @transform_3, window_bounds = array<i64: 1, 2, 256>}, {transform_indices = @transform_4, window_bounds = array<i64: 1, 1, 192>}, {transform_indices = @transform_5, window_bounds = array<i64: 1, 64, 192>}, {transform_indices = @transform_6, window_bounds = array<i64: 1, 64, 64>}, {transform_indices = @transform_7, window_bounds = array<i64: 1, 64, 256>}, {transform_indices = @transform_8, window_bounds = array<i64: 1, 256, 64>}, {pipeline_mode = #tpu.pipeline_mode<synchronous>, transform_indices = @transform_9, window_bounds = array<i64: 8, 64>}]} {
    %c0_i32 = arith.constant 0 : i32
    %0 = arith.cmpi eq, %arg0, %c0_i32 : i32
    %1 = arith.extui %0 : i1 to i32
    %c0_i32_0 = arith.constant 0 : i32
    %2 = arith.cmpi ne, %1, %c0_i32_0 : i32
    scf.if %2 {
      %c0_66 = arith.constant 0 : index
      %c0_67 = arith.constant 0 : index
      %165 = vector.load %arg2[%c0_66, %c0_67] : memref<8x64xf32, #tpu.memory_space<vmem>>, vector<8x64xf32>
      %c0_68 = arith.constant 0 : index
      %c0_69 = arith.constant 0 : index
      %166 = vector.load %arg11[%c0_68, %c0_69] : memref<8x64xf32, #tpu.memory_space<vmem>>, vector<8x64xf32>
      tpu.vector_store %arg11[%c0_68, %c0_69], %165 {strides = array<i32>} : memref<8x64xf32, #tpu.memory_space<vmem>>, vector<8x64xf32>,
    } else {
    }
    %c0 = arith.constant 0 : index
    %c0_1 = arith.constant 0 : index
    %3 = vector.load %arg11[%c0, %c0_1] : memref<8x64xf32, #tpu.memory_space<vmem>>, vector<8x64xf32>
    %c0_2 = arith.constant 0 : index
    %c0_3 = arith.constant 0 : index
    %c0_4 = arith.constant 0 : index
    %4 = vector.load %arg4[%c0_2, %c0_3, %c0_4] : memref<1x8x64xf32, #tpu.memory_space<vmem>>, vector<1x1x64xf32>
    %5 = vector.shape_cast %4 : vector<1x1x64xf32> to vector<64xf32>
    %c0_5 = arith.constant 0 : index
    %c1 = arith.constant 1 : index
    %c0_6 = arith.constant 0 : index
    %6 = vector.load %arg4[%c0_5, %c1, %c0_6] : memref<1x8x64xf32, #tpu.memory_space<vmem>>, vector<1x1x64xf32>
    %7 = vector.shape_cast %6 : vector<1x1x64xf32> to vector<64xf32>
    %cst = arith.constant dense<0.000000e+00> : vector<8xf32>
    %8 = vector.multi_reduction <add>, %3, %cst [1] : vector<8x64xf32> to vector<8xf32>
    %9 = vector.shape_cast %8 : vector<8xf32> to vector<8x1xf32>
    %cst_7 = arith.constant 6.400000e+01 : f32
    %10 = vector.broadcast %cst_7 : f32 to vector<8x1xf32>
    %11 = arith.divf %9, %10 : vector<8x1xf32>
    %12 = vector.broadcast %11 : vector<8x1xf32> to vector<8x64xf32>
    %13 = arith.subf %3, %12 : vector<8x64xf32>
    %14 = arith.mulf %13, %13 : vector<8x64xf32>
    %cst_8 = arith.constant dense<0.000000e+00> : vector<8xf32>
    %15 = vector.multi_reduction <add>, %14, %cst_8 [1] : vector<8x64xf32> to vector<8xf32>
    %16 = vector.shape_cast %15 : vector<8xf32> to vector<8x1xf32>
    %cst_9 = arith.constant 6.400000e+01 : f32
    %17 = vector.broadcast %cst_9 : f32 to vector<8x1xf32>
    %18 = arith.divf %16, %17 : vector<8x1xf32>
    %19 = vector.broadcast %11 : vector<8x1xf32> to vector<8x64xf32>
    %20 = arith.subf %3, %19 : vector<8x64xf32>
    %cst_10 = arith.constant 9.99999974E-6 : f32
    %21 = vector.broadcast %cst_10 : f32 to vector<8x1xf32>
    %22 = arith.addf %18, %21 : vector<8x1xf32>
    %23 = math.rsqrt %22 : vector<8x1xf32>
    %24 = vector.broadcast %23 : vector<8x1xf32> to vector<8x64xf32>
    %25 = arith.mulf %20, %24 : vector<8x64xf32>
    %26 = vector.shape_cast %5 : vector<64xf32> to vector<1x64xf32>
    %27 = vector.broadcast %26 : vector<1x64xf32> to vector<8x64xf32>
    %28 = arith.mulf %25, %27 : vector<8x64xf32>
    %29 = vector.shape_cast %7 : vector<64xf32> to vector<1x64xf32>
    %30 = vector.broadcast %29 : vector<1x64xf32> to vector<8x64xf32>
    %31 = arith.addf %28, %30 : vector<8x64xf32>
    %32 = arith.truncf %31 : vector<8x64xf32> to vector<8x64xbf16>
    %c0_11 = arith.constant 0 : index
    %c0_12 = arith.constant 0 : index
    %c0_13 = arith.constant 0 : index
    %33 = vector.load %arg7[%c0_11, %c0_12, %c0_13] : memref<1x64x192xi8, #tpu.memory_space<vmem>>, vector<1x64x192xi8>
    %34 = vector.shape_cast %33 : vector<1x64x192xi8> to vector<64x192xi8>
    %35 = arith.sitofp %34 : vector<64x192xi8> to vector<64x192xbf16>
    %cst_14 = arith.constant dense<0.000000e+00> : vector<8x192xf32>
    %36 = tpu.matmul %32, %35, %cst_14 {dimension_numbers = #tpu.dot_dimension_numbers<[1], [0], [0], [1], [0, 0, 1, 1], [], []>} : vector<8x64xbf16>, vector<64x192xbf16>, vector<8x192xf32> -> vector<8x192xf32>
    %c0_15 = arith.constant 0 : index
    %c0_16 = arith.constant 0 : index
    %c0_17 = arith.constant 0 : index
    %37 = vector.load %arg6[%c0_15, %c0_16, %c0_17] : memref<1x1x192xf32, #tpu.memory_space<vmem>>, vector<1x1x192xf32>
    %38 = vector.shape_cast %37 : vector<1x1x192xf32> to vector<1x192xf32>
    %39 = vector.broadcast %38 : vector<1x192xf32> to vector<8x192xf32>
    %40 = arith.mulf %36, %39 : vector<8x192xf32>
    %41 = vector.extract_strided_slice %40 {offsets = [0, 0], sizes = [8, 64], strides = [1, 1]} : vector<8x192xf32> to vector<8x64xf32>
    %42 = vector.shape_cast %41 : vector<8x64xf32> to vector<8x4x16xf32>
    %43 = vector.extract_strided_slice %40 {offsets = [0, 64], sizes = [8, 64], strides = [1, 1]} : vector<8x192xf32> to vector<8x64xf32>
    %44 = vector.shape_cast %43 : vector<8x64xf32> to vector<8x4x16xf32>
    %45 = vector.extract_strided_slice %40 {offsets = [0, 128], sizes = [8, 64], strides = [1, 1]} : vector<8x192xf32> to vector<8x64xf32>
    %46 = vector.shape_cast %45 : vector<8x64xf32> to vector<8x4x16xf32>
    %47 = tpu.iota {dimensions = array<i32: 0>} : vector<8x8xi32>
    %48 = tpu.iota {dimensions = array<i32: 1>} : vector<8x8xi32>
    %49 = arith.cmpi sle, %48, %47 : vector<8x8xi32>
    %c0_18 = arith.constant 0 : index
    %50 = memref.load %arg1[%c0_18] : memref<1xi32, #tpu.memory_space<smem>>
    %51 = vector.broadcast %50 : i32 to vector<8x8xi32>
    %52 = arith.cmpi slt, %48, %51 : vector<8x8xi32>
    %53 = arith.andi %49, %52 : vector<8x8xi1>
    "tpu.trace_start"() <{level = 10 : i32, message = "qhd,khd->hqk"}> : () -> ()
    %cst_19 = arith.constant dense<0.000000e+00> : vector<4x8x8xf32>
    %54 = tpu.matmul %42, %44, %cst_19 {dimension_numbers = #tpu.dot_dimension_numbers<[2], [2], [0], [0], [0, 1, 0, 0, 1, 0], [1], [1]>} : vector<8x4x16xf32>, vector<8x4x16xf32>, vector<4x8x8xf32> -> vector<4x8x8xf32>
    "tpu.trace_stop"() : () -> ()
    %55 = vector.shape_cast %53 : vector<8x8xi1> to vector<1x8x8xi1>
    %cst_20 = arith.constant -3.40282347E+38 : f32
    %56 = vector.shape_cast %55 : vector<1x8x8xi1> to vector<1x8x8xi1>
    %57 = vector.broadcast %56 : vector<1x8x8xi1> to vector<4x8x8xi1>
    %58 = vector.broadcast %cst_20 : f32 to vector<4x8x8xf32>
    %59 = arith.select %57, %54, %58 : vector<4x8x8xi1>, vector<4x8x8xf32>
    %cst_21 = arith.constant dense<0xFF800000> : vector<4x8xf32>
    %60 = vector.multi_reduction <maximumf>, %59, %cst_21 [2] : vector<4x8x8xf32> to vector<4x8xf32>
    %61 = vector.shape_cast %60 : vector<4x8xf32> to vector<4x8x1xf32>
    %62 = vector.broadcast %61 : vector<4x8x1xf32> to vector<4x8x8xf32>
    %63 = arith.subf %59, %62 : vector<4x8x8xf32>
    %64 = math.exp %63 : vector<4x8x8xf32>
    %cst_22 = arith.constant dense<0.000000e+00> : vector<4x8xf32>
    %65 = vector.multi_reduction <add>, %64, %cst_22 [2] : vector<4x8x8xf32> to vector<4x8xf32>
    %66 = vector.shape_cast %65 : vector<4x8xf32> to vector<4x8x1xf32>
    %67 = tpu.reciprocal %66 {approx = true} : vector<4x8x1xf32> -> vector<4x8x1xf32>
    %68 = vector.broadcast %67 : vector<4x8x1xf32> to vector<4x8x8xf32>
    %69 = arith.mulf %64, %68 : vector<4x8x8xf32>
    "tpu.trace_start"() <{level = 10 : i32, message = "hqk,khd->qhd"}> : () -> ()
    %cst_23 = arith.constant dense<0.000000e+00> : vector<4x16x8xf32>
    %70 = tpu.matmul %46, %69, %cst_23 {dimension_numbers = #tpu.dot_dimension_numbers<[0], [2], [2], [1], [0, 1, 0, 2, 1, 1], [1], [0]>} : vector<8x4x16xf32>, vector<4x8x8xf32>, vector<4x16x8xf32> -> vector<4x16x8xf32>
    %71 = tpu.transpose %70, [2, 0, 1] : vector<4x16x8xf32> -> vector<8x4x16xf32>
    "tpu.trace_stop"() : () -> ()
    %72 = vector.shape_cast %71 : vector<8x4x16xf32> to vector<8x64xf32>
    %73 = arith.truncf %72 : vector<8x64xf32> to vector<8x64xbf16>
    %c0_24 = arith.constant 0 : index
    %c0_25 = arith.constant 0 : index
    %c0_26 = arith.constant 0 : index
    %74 = vector.load %arg8[%c0_24, %c0_25, %c0_26] : memref<1x64x64xi8, #tpu.memory_space<vmem>>, vector<1x64x64xi8>
    %75 = vector.shape_cast %74 : vector<1x64x64xi8> to vector<64x64xi8>
    %76 = arith.sitofp %75 : vector<64x64xi8> to vector<64x64xbf16>
    %cst_27 = arith.constant dense<0.000000e+00> : vector<8x64xf32>
    %77 = tpu.matmul %73, %76, %cst_27 {dimension_numbers = #tpu.dot_dimension_numbers<[1], [0], [0], [1], [0, 0, 1, 1], [], []>} : vector<8x64xbf16>, vector<64x64xbf16>, vector<8x64xf32> -> vector<8x64xf32>
    %c0_28 = arith.constant 0 : index
    %c6 = arith.constant 6 : index
    %c0_29 = arith.constant 0 : index
    %78 = vector.load %arg4[%c0_28, %c6, %c0_29] : memref<1x8x64xf32, #tpu.memory_space<vmem>>, vector<1x1x64xf32>
    %79 = vector.shape_cast %78 : vector<1x1x64xf32> to vector<64xf32>
    %80 = vector.shape_cast %79 : vector<64xf32> to vector<1x64xf32>
    %81 = vector.broadcast %80 : vector<1x64xf32> to vector<8x64xf32>
    %82 = arith.mulf %77, %81 : vector<8x64xf32>
    %c0_30 = arith.constant 0 : index
    %c4 = arith.constant 4 : index
    %c0_31 = arith.constant 0 : index
    %83 = vector.load %arg4[%c0_30, %c4, %c0_31] : memref<1x8x64xf32, #tpu.memory_space<vmem>>, vector<1x1x64xf32>
    %84 = vector.shape_cast %83 : vector<1x1x64xf32> to vector<64xf32>
    %85 = vector.shape_cast %84 : vector<64xf32> to vector<1x64xf32>
    %86 = vector.broadcast %85 : vector<1x64xf32> to vector<8x64xf32>
    %87 = arith.addf %82, %86 : vector<8x64xf32>
    %88 = arith.addf %3, %87 : vector<8x64xf32>
    %c0_32 = arith.constant 0 : index
    %c2 = arith.constant 2 : index
    %c0_33 = arith.constant 0 : index
    %89 = vector.load %arg4[%c0_32, %c2, %c0_33] : memref<1x8x64xf32, #tpu.memory_space<vmem>>, vector<1x1x64xf32>
    %90 = vector.shape_cast %89 : vector<1x1x64xf32> to vector<64xf32>
    %c0_34 = arith.constant 0 : index
    %c3 = arith.constant 3 : index
    %c0_35 = arith.constant 0 : index
    %91 = vector.load %arg4[%c0_34, %c3, %c0_35] : memref<1x8x64xf32, #tpu.memory_space<vmem>>, vector<1x1x64xf32>
    %92 = vector.shape_cast %91 : vector<1x1x64xf32> to vector<64xf32>
    %cst_36 = arith.constant dense<0.000000e+00> : vector<8xf32>
    %93 = vector.multi_reduction <add>, %88, %cst_36 [1] : vector<8x64xf32> to vector<8xf32>
    %94 = vector.shape_cast %93 : vector<8xf32> to vector<8x1xf32>
    %cst_37 = arith.constant 6.400000e+01 : f32
    %95 = vector.broadcast %cst_37 : f32 to vector<8x1xf32>
    %96 = arith.divf %94, %95 : vector<8x1xf32>
    %97 = vector.broadcast %96 : vector<8x1xf32> to vector<8x64xf32>
    %98 = arith.subf %88, %97 : vector<8x64xf32>
    %99 = arith.mulf %98, %98 : vector<8x64xf32>
    %cst_38 = arith.constant dense<0.000000e+00> : vector<8xf32>
    %100 = vector.multi_reduction <add>, %99, %cst_38 [1] : vector<8x64xf32> to vector<8xf32>
    %101 = vector.shape_cast %100 : vector<8xf32> to vector<8x1xf32>
    %cst_39 = arith.constant 6.400000e+01 : f32
    %102 = vector.broadcast %cst_39 : f32 to vector<8x1xf32>
    %103 = arith.divf %101, %102 : vector<8x1xf32>
    %104 = vector.broadcast %96 : vector<8x1xf32> to vector<8x64xf32>
    %105 = arith.subf %88, %104 : vector<8x64xf32>
    %cst_40 = arith.constant 9.99999974E-6 : f32
    %106 = vector.broadcast %cst_40 : f32 to vector<8x1xf32>
    %107 = arith.addf %103, %106 : vector<8x1xf32>
    %108 = math.rsqrt %107 : vector<8x1xf32>
    %109 = vector.broadcast %108 : vector<8x1xf32> to vector<8x64xf32>
    %110 = arith.mulf %105, %109 : vector<8x64xf32>
    %111 = vector.shape_cast %90 : vector<64xf32> to vector<1x64xf32>
    %112 = vector.broadcast %111 : vector<1x64xf32> to vector<8x64xf32>
    %113 = arith.mulf %110, %112 : vector<8x64xf32>
    %114 = vector.shape_cast %92 : vector<64xf32> to vector<1x64xf32>
    %115 = vector.broadcast %114 : vector<1x64xf32> to vector<8x64xf32>
    %116 = arith.addf %113, %115 : vector<8x64xf32>
    %117 = arith.truncf %116 : vector<8x64xf32> to vector<8x64xbf16>
    %c0_41 = arith.constant 0 : index
    %c0_42 = arith.constant 0 : index
    %c0_43 = arith.constant 0 : index
    %118 = vector.load %arg9[%c0_41, %c0_42, %c0_43] : memref<1x64x256xi8, #tpu.memory_space<vmem>>, vector<1x64x256xi8>
    %119 = vector.shape_cast %118 : vector<1x64x256xi8> to vector<64x256xi8>
    %120 = arith.sitofp %119 : vector<64x256xi8> to vector<64x256xbf16>
    %cst_44 = arith.constant dense<0.000000e+00> : vector<8x256xf32>
    %121 = tpu.matmul %117, %120, %cst_44 {dimension_numbers = #tpu.dot_dimension_numbers<[1], [0], [0], [1], [0, 0, 1, 1], [], []>} : vector<8x64xbf16>, vector<64x256xbf16>, vector<8x256xf32> -> vector<8x256xf32>
    %c0_45 = arith.constant 0 : index
    %c1_46 = arith.constant 1 : index
    %c0_47 = arith.constant 0 : index
    %122 = vector.load %arg5[%c0_45, %c1_46, %c0_47] : memref<1x2x256xf32, #tpu.memory_space<vmem>>, vector<1x1x256xf32>
    %123 = vector.shape_cast %122 : vector<1x1x256xf32> to vector<256xf32>
    %124 = vector.shape_cast %123 : vector<256xf32> to vector<1x256xf32>
    %125 = vector.broadcast %124 : vector<1x256xf32> to vector<8x256xf32>
    %126 = arith.mulf %121, %125 : vector<8x256xf32>
    %c0_48 = arith.constant 0 : index
    %c0_49 = arith.constant 0 : index
    %c0_50 = arith.constant 0 : index
    %127 = vector.load %arg5[%c0_48, %c0_49, %c0_50] : memref<1x2x256xf32, #tpu.memory_space<vmem>>, vector<1x1x256xf32>
    %128 = vector.shape_cast %127 : vector<1x1x256xf32> to vector<256xf32>
    %129 = vector.shape_cast %128 : vector<256xf32> to vector<1x256xf32>
    %130 = vector.broadcast %129 : vector<1x256xf32> to vector<8x256xf32>
    %131 = arith.addf %126, %130 : vector<8x256xf32>
    %132 = arith.mulf %131, %131 : vector<8x256xf32>
    %133 = arith.mulf %131, %132 : vector<8x256xf32>
    %cst_51 = arith.constant 4.471500e-02 : f32
    %134 = vector.broadcast %cst_51 : f32 to vector<8x256xf32>
    %135 = arith.mulf %134, %133 : vector<8x256xf32>
    %136 = arith.addf %131, %135 : vector<8x256xf32>
    %cst_52 = arith.constant 0.797884583 : f32
    %137 = vector.broadcast %cst_52 : f32 to vector<8x256xf32>
    %138 = arith.mulf %137, %136 : vector<8x256xf32>
    %139 = math.tanh %138 : vector<8x256xf32>
    %cst_53 = arith.constant 1.000000e+00 : f32
    %140 = vector.broadcast %cst_53 : f32 to vector<8x256xf32>
    %141 = arith.addf %140, %139 : vector<8x256xf32>
    %cst_54 = arith.constant 5.000000e-01 : f32
    %142 = vector.broadcast %cst_54 : f32 to vector<8x256xf32>
    %143 = arith.mulf %142, %141 : vector<8x256xf32>
    %144 = arith.mulf %131, %143 : vector<8x256xf32>
    %145 = arith.truncf %144 : vector<8x256xf32> to vector<8x256xbf16>
    %c0_55 = arith.constant 0 : index
    %c0_56 = arith.constant 0 : index
    %c0_57 = arith.constant 0 : index
    %146 = vector.load %arg10[%c0_55, %c0_56, %c0_57] : memref<1x256x64xi8, #tpu.memory_space<vmem>>, vector<1x256x64xi8>
    %147 = vector.shape_cast %146 : vector<1x256x64xi8> to vector<256x64xi8>
    %148 = arith.sitofp %147 : vector<256x64xi8> to vector<256x64xbf16>
    %cst_58 = arith.constant dense<0.000000e+00> : vector<8x64xf32>
    %149 = tpu.matmul %145, %148, %cst_58 {dimension_numbers = #tpu.dot_dimension_numbers<[1], [0], [0], [1], [0, 0, 1, 1], [], []>} : vector<8x256xbf16>, vector<256x64xbf16>, vector<8x64xf32> -> vector<8x64xf32>
    %c0_59 = arith.constant 0 : index
    %c7 = arith.constant 7 : index
    %c0_60 = arith.constant 0 : index
    %150 = vector.load %arg4[%c0_59, %c7, %c0_60] : memref<1x8x64xf32, #tpu.memory_space<vmem>>, vector<1x1x64xf32>
    %151 = vector.shape_cast %150 : vector<1x1x64xf32> to vector<64xf32>
    %152 = vector.shape_cast %151 : vector<64xf32> to vector<1x64xf32>
    %153 = vector.broadcast %152 : vector<1x64xf32> to vector<8x64xf32>
    %154 = arith.mulf %149, %153 : vector<8x64xf32>
    %c0_61 = arith.constant 0 : index
    %c5 = arith.constant 5 : index
    %c0_62 = arith.constant 0 : index
    %155 = vector.load %arg4[%c0_61, %c5, %c0_62] : memref<1x8x64xf32, #tpu.memory_space<vmem>>, vector<1x1x64xf32>
    %156 = vector.shape_cast %155 : vector<1x1x64xf32> to vector<64xf32>
    %157 = vector.shape_cast %156 : vector<64xf32> to vector<1x64xf32>
    %158 = vector.broadcast %157 : vector<1x64xf32> to vector<8x64xf32>
    %159 = arith.addf %154, %158 : vector<8x64xf32>
    %160 = arith.addf %88, %159 : vector<8x64xf32>
    %c0_63 = arith.constant 0 : index
    %c0_64 = arith.constant 0 : index
    %161 = vector.load %arg11[%c0_63, %c0_64] : memref<8x64xf32, #tpu.memory_space<vmem>>, vector<8x64xf32>
    tpu.vector_store %arg11[%c0_63, %c0_64], %160 {strides = array<i32>} : memref<8x64xf32, #tpu.memory_space<vmem>>, vector<8x64xf32>,
    %c1_i32 = arith.constant 1 : i32
    %162 = arith.cmpi eq, %arg0, %c1_i32 : i32
    %163 = arith.extui %162 : i1 to i32
    %c0_i32_65 = arith.constant 0 : i32
    %164 = arith.cmpi ne, %163, %c0_i32_65 : i32
    scf.if %164 {
      %c0_66 = arith.constant 0 : index
      %c0_67 = arith.constant 0 : index
      %165 = vector.load %arg3[%c0_66, %c0_67] : memref<2x64xf32, #tpu.memory_space<vmem>>, vector<1x64xf32>
      %166 = vector.shape_cast %165 : vector<1x64xf32> to vector<64xf32>
      %c1_68 = arith.constant 1 : index
      %c0_69 = arith.constant 0 : index
      %167 = vector.load %arg3[%c1_68, %c0_69] : memref<2x64xf32, #tpu.memory_space<vmem>>, vector<1x64xf32>
      %168 = vector.shape_cast %167 : vector<1x64xf32> to vector<64xf32>
      %cst_70 = arith.constant dense<0.000000e+00> : vector<8xf32>
      %169 = vector.multi_reduction <add>, %160, %cst_70 [1] : vector<8x64xf32> to vector<8xf32>
      %170 = vector.shape_cast %169 : vector<8xf32> to vector<8x1xf32>
      %cst_71 = arith.constant 6.400000e+01 : f32
      %171 = vector.broadcast %cst_71 : f32 to vector<8x1xf32>
      %172 = arith.divf %170, %171 : vector<8x1xf32>
      %173 = vector.broadcast %172 : vector<8x1xf32> to vector<8x64xf32>
      %174 = arith.subf %160, %173 : vector<8x64xf32>
      %175 = arith.mulf %174, %174 : vector<8x64xf32>
      %cst_72 = arith.constant dense<0.000000e+00> : vector<8xf32>
      %176 = vector.multi_reduction <add>, %175, %cst_72 [1] : vector<8x64xf32> to vector<8xf32>
      %177 = vector.shape_cast %176 : vector<8xf32> to vector<8x1xf32>
      %cst_73 = arith.constant 6.400000e+01 : f32
      %178 = vector.broadcast %cst_73 : f32 to vector<8x1xf32>
      %179 = arith.divf %177, %178 : vector<8x1xf32>
      %180 = vector.broadcast %172 : vector<8x1xf32> to vector<8x64xf32>
      %181 = arith.subf %160, %180 : vector<8x64xf32>
      %cst_74 = arith.constant 9.99999974E-6 : f32
      %182 = vector.broadcast %cst_74 : f32 to vector<8x1xf32>
      %183 = arith.addf %179, %182 : vector<8x1xf32>
      %184 = math.rsqrt %183 : vector<8x1xf32>
      %185 = vector.broadcast %184 : vector<8x1xf32> to vector<8x64xf32>
      %186 = arith.mulf %181, %185 : vector<8x64xf32>
      %187 = vector.shape_cast %166 : vector<64xf32> to vector<1x64xf32>
      %188 = vector.broadcast %187 : vector<1x64xf32> to vector<8x64xf32>
      %189 = arith.mulf %186, %188 : vector<8x64xf32>
      %190 = vector.shape_cast %168 : vector<64xf32> to vector<1x64xf32>
      %191 = vector.broadcast %190 : vector<1x64xf32> to vector<8x64xf32>
      %192 = arith.addf %189, %191 : vector<8x64xf32>
      %c0_75 = arith.constant 0 : index
      %c0_76 = arith.constant 0 : index
      %193 = vector.load %arg11[%c0_75, %c0_76] : memref<8x64xf32, #tpu.memory_space<vmem>>, vector<8x64xf32>
      tpu.vector_store %arg11[%c0_75, %c0_76], %192 {strides = array<i32>} : memref<8x64xf32, #tpu.memory_space<vmem>>, vector<8x64xf32>,
    } else {
    }
    return
  }
  func.func @transform_0(%arg0: i32, %arg1: memref<1xi32, #tpu.memory_space<smem>>) -> (i32, i32) {
    %c0_i32 = arith.constant 0 : i32
    %c0_i32_0 = arith.constant 0 : i32
    %c0_i32_1 = arith.constant 0 : i32
    return %c0_i32, %c0_i32_0 : i32, i32
  }
  func.func @transform_1(%arg0: i32, %arg1: memref<1xi32, #tpu.memory_space<smem>>) -> (i32, i32) {
    %c0_i32 = arith.constant 0 : i32
    %c0_i32_0 = arith.constant 0 : i32
    %c0_i32_1 = arith.constant 0 : i32
    return %c0_i32, %c0_i32_0 : i32, i32
  }
  func.func @transform_2(%arg0: i32, %arg1: memref<1xi32, #tpu.memory_space<smem>>) -> (i32, i32, i32) {
    %c0_i32 = arith.constant 0 : i32
    %c0_i32_0 = arith.constant 0 : i32
    %c0_i32_1 = arith.constant 0 : i32
    return %arg0, %c0_i32, %c0_i32_0 : i32, i32, i32
  }
  func.func @transform_3(%arg0: i32, %arg1: memref<1xi32, #tpu.memory_space<smem>>) -> (i32, i32, i32) {
    %c0_i32 = arith.constant 0 : i32
    %c0_i32_0 = arith.constant 0 : i32
    %c0_i32_1 = arith.constant 0 : i32
    return %arg0, %c0_i32, %c0_i32_0 : i32, i32, i32
  }
  func.func @transform_4(%arg0: i32, %arg1: memref<1xi32, #tpu.memory_space<smem>>) -> (i32, i32, i32) {
    %c0_i32 = arith.constant 0 : i32
    %c0_i32_0 = arith.constant 0 : i32
    %c0_i32_1 = arith.constant 0 : i32
    return %arg0, %c0_i32, %c0_i32_0 : i32, i32, i32
  }
  func.func @transform_5(%arg0: i32, %arg1: memref<1xi32, #tpu.memory_space<smem>>) -> (i32, i32, i32) {
    %c0_i32 = arith.constant 0 : i32
    %c0_i32_0 = arith.constant 0 : i32
    %c0_i32_1 = arith.constant 0 : i32
    return %arg0, %c0_i32, %c0_i32_0 : i32, i32, i32
  }
  func.func @transform_6(%arg0: i32, %arg1: memref<1xi32, #tpu.memory_space<smem>>) -> (i32, i32, i32) {
    %c0_i32 = arith.constant 0 : i32
    %c0_i32_0 = arith.constant 0 : i32
    %c0_i32_1 = arith.constant 0 : i32
    return %arg0, %c0_i32, %c0_i32_0 : i32, i32, i32
  }
  func.func @transform_7(%arg0: i32, %arg1: memref<1xi32, #tpu.memory_space<smem>>) -> (i32, i32, i32) {
    %c0_i32 = arith.constant 0 : i32
    %c0_i32_0 = arith.constant 0 : i32
    %c0_i32_1 = arith.constant 0 : i32
    return %arg0, %c0_i32, %c0_i32_0 : i32, i32, i32
  }
  func.func @transform_8(%arg0: i32, %arg1: memref<1xi32, #tpu.memory_space<smem>>) -> (i32, i32, i32) {
    %c0_i32 = arith.constant 0 : i32
    %c0_i32_0 = arith.constant 0 : i32
    %c0_i32_1 = arith.constant 0 : i32
    return %arg0, %c0_i32, %c0_i32_0 : i32, i32, i32
  }
  func.func @transform_9(%arg0: i32, %arg1: memref<1xi32, #tpu.memory_space<smem>>) -> (i32, i32) {
    %c0_i32 = arith.constant 0 : i32
    %c0_i32_0 = arith.constant 0 : i32
    %c0_i32_1 = arith.constant 0 : i32
    return %c0_i32, %c0_i32_0 : i32, i32
  }
}

module attributes {stable_mosaic.version = 11 : i64} {
  func.func @gptneo_layers_kernel(%arg0: i32, %arg1: memref<1xi32, #tpu.memory_space<smem>>, %arg2: memref<8x64xf32, #tpu.memory_space<vmem>>, %arg3: memref<2x64xf32, #tpu.memory_space<vmem>>, %arg4: memref<1x8x64xf32, #tpu.memory_space<vmem>>, %arg5: memref<1x2x256xf32, #tpu.memory_space<vmem>>, %arg6: memref<1x1x192xf32, #tpu.memory_space<vmem>>, %arg7: memref<1x64x192xi8, #tpu.memory_space<vmem>>, %arg8: memref<1x64x64xi8, #tpu.memory_space<vmem>>, %arg9: memref<1x64x256xi8, #tpu.memory_space<vmem>>, %arg10: memref<1x256x64xi8, #tpu.memory_space<vmem>>, %arg11: memref<8x64xf32, #tpu.memory_space<vmem>>) attributes {dimension_semantics = [#tpu.dimension_semantics<arbitrary>], iteration_bounds = array<i64: 2>, scalar_prefetch = 1 : i64, scratch_operands = 0 : i64, tpu.core_type = #tpu.core_type<tc>, window_params = [{pipeline_mode = #tpu.pipeline_mode<synchronous>, transform_indices = @transform_0, window_bounds = array<i64: 8, 64>}, {pipeline_mode = #tpu.pipeline_mode<synchronous>, transform_indices = @transform_1, window_bounds = array<i64: 2, 64>}, {transform_indices = @transform_2, window_bounds = array<i64: 1, 8, 64>}, {transform_indices = @transform_3, window_bounds = array<i64: 1, 2, 256>}, {transform_indices = @transform_4, window_bounds = array<i64: 1, 1, 192>}, {transform_indices = @transform_5, window_bounds = array<i64: 1, 64, 192>}, {transform_indices = @transform_6, window_bounds = array<i64: 1, 64, 64>}, {transform_indices = @transform_7, window_bounds = array<i64: 1, 64, 256>}, {transform_indices = @transform_8, window_bounds = array<i64: 1, 256, 64>}, {pipeline_mode = #tpu.pipeline_mode<synchronous>, transform_indices = @transform_9, window_bounds = array<i64: 8, 64>}]} {
    %c0_i32 = arith.constant 0 : i32
    %0 = arith.cmpi eq, %arg0, %c0_i32 : i32
    %1 = arith.extui %0 : i1 to i32
    %c0_i32_0 = arith.constant 0 : i32
    %2 = arith.cmpi ne, %1, %c0_i32_0 : i32
    scf.if %2 {
      %c0_66 = arith.constant 0 : index
      %c0_67 = arith.constant 0 : index
      %165 = vector.load %arg2[%c0_66, %c0_67] : memref<8x64xf32, #tpu.memory_space<vmem>>, vector<8x64xf32>
      %c0_68 = arith.constant 0 : index
      %c0_69 = arith.constant 0 : index
      %166 = vector.load %arg11[%c0_68, %c0_69] : memref<8x64xf32, #tpu.memory_space<vmem>>, vector<8x64xf32>
      tpu.vector_store %arg11[%c0_68, %c0_69], %165 {strides = array<i32>} : memref<8x64xf32, #tpu.memory_space<vmem>>, vector<8x64xf32>,
    } else {
    }
    %c0 = arith.constant 0 : index
    %c0_1 = arith.constant 0 : index
    %3 = vector.load %arg11[%c0, %c0_1] : memref<8x64xf32, #tpu.memory_space<vmem>>, vector<8x64xf32>
    %c0_2 = arith.constant 0 : index
    %c0_3 = arith.constant 0 : index
    %c0_4 = arith.constant 0 : index
    %4 = vector.load %arg4[%c0_2, %c0_3, %c0_4] : memref<1x8x64xf32, #tpu.memory_space<vmem>>, vector<1x1x64xf32>
    %5 = vector.shape_cast %4 : vector<1x1x64xf32> to vector<64xf32>
    %c0_5 = arith.constant 0 : index
    %c1 = arith.constant 1 : index
    %c0_6 = arith.constant 0 : index
    %6 = vector.load %arg4[%c0_5, %c1, %c0_6] : memref<1x8x64xf32, #tpu.memory_space<vmem>>, vector<1x1x64xf32>
    %7 = vector.shape_cast %6 : vector<1x1x64xf32> to vector<64xf32>
    %cst = arith.constant dense<0.000000e+00> : vector<8xf32>
    %8 = vector.multi_reduction <add>, %3, %cst [1] : vector<8x64xf32> to vector<8xf32>
    %9 = vector.shape_cast %8 : vector<8xf32> to vector<8x1xf32>
    %cst_7 = arith.constant 6.400000e+01 : f32
    %10 = vector.broadcast %cst_7 : f32 to vector<8x1xf32>
    %11 = arith.divf %9, %10 : vector<8x1xf32>
    %12 = vector.broadcast %11 : vector<8x1xf32> to vector<8x64xf32>
    %13 = arith.subf %3, %12 : vector<8x64xf32>
    %14 = arith.mulf %13, %13 : vector<8x64xf32>
    %cst_8 = arith.constant dense<0.000000e+00> : vector<8xf32>
    %15 = vector.multi_reduction <add>, %14, %cst_8 [1] : vector<8x64xf32> to vector<8xf32>
    %16 = vector.shape_cast %15 : vector<8xf32> to vector<8x1xf32>
    %cst_9 = arith.constant 6.400000e+01 : f32
    %17 = vector.broadcast %cst_9 : f32 to vector<8x1xf32>
    %18 = arith.divf %16, %17 : vector<8x1xf32>
    %19 = vector.broadcast %11 : vector<8x1xf32> to vector<8x64xf32>
    %20 = arith.subf %3, %19 : vector<8x64xf32>
    %cst_10 = arith.constant 9.99999974E-6 : f32
    %21 = vector.broadcast %cst_10 : f32 to vector<8x1xf32>
    %22 = arith.addf %18, %21 : vector<8x1xf32>
    %23 = math.rsqrt %22 : vector<8x1xf32>
    %24 = vector.broadcast %23 : vector<8x1xf32> to vector<8x64xf32>
    %25 = arith.mulf %20, %24 : vector<8x64xf32>
    %26 = vector.shape_cast %5 : vector<64xf32> to vector<1x64xf32>
    %27 = vector.broadcast %26 : vector<1x64xf32> to vector<8x64xf32>
    %28 = arith.mulf %25, %27 : vector<8x64xf32>
    %29 = vector.shape_cast %7 : vector<64xf32> to vector<1x64xf32>
    %30 = vector.broadcast %29 : vector<1x64xf32> to vector<8x64xf32>
    %31 = arith.addf %28, %30 : vector<8x64xf32>
    %32 = arith.truncf %31 : vector<8x64xf32> to vector<8x64xbf16>
    %c0_11 = arith.constant 0 : index
    %c0_12 = arith.constant 0 : index
    %c0_13 = arith.constant 0 : index
    %33 = vector.load %arg7[%c0_11, %c0_12, %c0_13] : memref<1x64x192xi8, #tpu.memory_space<vmem>>, vector<1x64x192xi8>
    %34 = vector.shape_cast %33 : vector<1x64x192xi8> to vector<64x192xi8>
    %35 = arith.sitofp %34 : vector<64x192xi8> to vector<64x192xbf16>
    %cst_14 = arith.constant dense<0.000000e+00> : vector<8x192xf32>
    %36 = tpu.matmul %32, %35, %cst_14 {dimension_numbers = #tpu.dot_dimension_numbers<[1], [0], [0], [1], [0, 0, 1, 1], [], []>} : vector<8x64xbf16>, vector<64x192xbf16>, vector<8x192xf32> -> vector<8x192xf32>
    %c0_15 = arith.constant 0 : index
    %c0_16 = arith.constant 0 : index
    %c0_17 = arith.constant 0 : index
    %37 = vector.load %arg6[%c0_15, %c0_16, %c0_17] : memref<1x1x192xf32, #tpu.memory_space<vmem>>, vector<1x1x192xf32>
    %38 = vector.shape_cast %37 : vector<1x1x192xf32> to vector<1x192xf32>
    %39 = vector.broadcast %38 : vector<1x192xf32> to vector<8x192xf32>
    %40 = arith.mulf %36, %39 : vector<8x192xf32>
    %41 = vector.extract_strided_slice %40 {offsets = [0, 0], sizes = [8, 64], strides = [1, 1]} : vector<8x192xf32> to vector<8x64xf32>
    %42 = vector.shape_cast %41 : vector<8x64xf32> to vector<8x4x16xf32>
    %43 = vector.extract_strided_slice %40 {offsets = [0, 64], sizes = [8, 64], strides = [1, 1]} : vector<8x192xf32> to vector<8x64xf32>
    %44 = vector.shape_cast %43 : vector<8x64xf32> to vector<8x4x16xf32>
    %45 = vector.extract_strided_slice %40 {offsets = [0, 128], sizes = [8, 64], strides = [1, 1]} : vector<8x192xf32> to vector<8x64xf32>
    %46 = vector.shape_cast %45 : vector<8x64xf32> to vector<8x4x16xf32>
    %47 = tpu.iota {dimensions = array<i32: 0>} : vector<8x8xi32>
    %48 = tpu.iota {dimensions = array<i32: 1>} : vector<8x8xi32>
    %49 = arith.cmpi sle, %48, %47 : vector<8x8xi32>
    %c0_18 = arith.constant 0 : index
    %50 = memref.load %arg1[%c0_18] : memref<1xi32, #tpu.memory_space<smem>>
    %51 = vector.broadcast %50 : i32 to vector<8x8xi32>
    %52 = arith.cmpi slt, %48, %51 : vector<8x8xi32>
    %53 = arith.andi %49, %52 : vector<8x8xi1>
    "tpu.trace_start"() <{level = 10 : i32, message = "qhd,khd->hqk"}> : () -> ()
    %cst_19 = arith.constant dense<0.000000e+00> : vector<4x8x8xf32>
    %54 = tpu.matmul %42, %44, %cst_19 {dimension_numbers = #tpu.dot_dimension_numbers<[2], [2], [0], [0], [0, 1, 0, 0, 1, 0], [1], [1]>} : vector<8x4x16xf32>, vector<8x4x16xf32>, vector<4x8x8xf32> -> vector<4x8x8xf32>
    "tpu.trace_stop"() : () -> ()
    %55 = vector.shape_cast %53 : vector<8x8xi1> to vector<1x8x8xi1>
    %cst_20 = arith.constant -3.40282347E+38 : f32
    %56 = vector.shape_cast %55 : vector<1x8x8xi1> to vector<1x8x8xi1>
    %57 = vector.broadcast %56 : vector<1x8x8xi1> to vector<4x8x8xi1>
    %58 = vector.broadcast %cst_20 : f32 to vector<4x8x8xf32>
    %59 = arith.select %57, %54, %58 : vector<4x8x8xi1>, vector<4x8x8xf32>
    %cst_21 = arith.constant dense<0xFF800000> : vector<4x8xf32>
    %60 = vector.multi_reduction <maximumf>, %59, %cst_21 [2] : vector<4x8x8xf32> to vector<4x8xf32>
    %61 = vector.shape_cast %60 : vector<4x8xf32> to vector<4x8x1xf32>
    %62 = vector.broadcast %61 : vector<4x8x1xf32> to vector<4x8x8xf32>
    %63 = arith.subf %59, %62 : vector<4x8x8xf32>
    %64 = math.exp %63 : vector<4x8x8xf32>
    %cst_22 = arith.constant dense<0.000000e+00> : vector<4x8xf32>
    %65 = vector.multi_reduction <add>, %64, %cst_22 [2] : vector<4x8x8xf32> to vector<4x8xf32>
    %66 = vector.shape_cast %65 : vector<4x8xf32> to vector<4x8x1xf32>
    %67 = tpu.reciprocal %66 {approx = true} : vector<4x8x1xf32> -> vector<4x8x1xf32>
    %68 = vector.broadcast %67 : vector<4x8x1xf32> to vector<4x8x8xf32>
    %69 = arith.mulf %64, %68 : vector<4x8x8xf32>
    "tpu.trace_start"() <{level = 10 : i32, message = "hqk,khd->qhd"}> : () -> ()
    %cst_23 = arith.constant dense<0.000000e+00> : vector<4x16x8xf32>
    %70 = tpu.matmul %46, %69, %cst_23 {dimension_numbers = #tpu.dot_dimension_numbers<[0], [2], [2], [1], [0, 1, 0, 2, 1, 1], [1], [0]>} : vector<8x4x16xf32>, vector<4x8x8xf32>, vector<4x16x8xf32> -> vector<4x16x8xf32>
    %71 = tpu.transpose %70, [2, 0, 1] : vector<4x16x8xf32> -> vector<8x4x16xf32>
    "tpu.trace_stop"() : () -> ()
    %72 = vector.shape_cast %71 : vector<8x4x16xf32> to vector<8x64xf32>
    %73 = arith.truncf %72 : vector<8x64xf32> to vector<8x64xbf16>
    %c0_24 = arith.constant 0 : index
    %c0_25 = arith.constant 0 : index
    %c0_26 = arith.constant 0 : index
    %74 = vector.load %arg8[%c0_24, %c0_25, %c0_26] : memref<1x64x64xi8, #tpu.memory_space<vmem>>, vector<1x64x64xi8>
    %75 = vector.shape_cast %74 : vector<1x64x64xi8> to vector<64x64xi8>
    %76 = arith.sitofp %75 : vector<64x64xi8> to vector<64x64xbf16>
    %cst_27 = arith.constant dense<0.000000e+00> : vector<8x64xf32>
    %77 = tpu.matmul %73, %76, %cst_27 {dimension_numbers = #tpu.dot_dimension_numbers<[1], [0], [0], [1], [0, 0, 1, 1], [], []>} : vector<8x64xbf16>, vector<64x64xbf16>, vector<8x64xf32> -> vector<8x64xf32>
    %c0_28 = arith.constant 0 : index
    %c6 = arith.constant 6 : index
    %c0_29 = arith.constant 0 : index
    %78 = vector.load %arg4[%c0_28, %c6, %c0_29] : memref<1x8x64xf32, #tpu.memory_space<vmem>>, vector<1x1x64xf32>
    %79 = vector.shape_cast %78 : vector<1x1x64xf32> to vector<64xf32>
    %80 = vector.shape_cast %79 : vector<64xf32> to vector<1x64xf32>
    %81 = vector.broadcast %80 : vector<1x64xf32> to vector<8x64xf32>
    %82 = arith.mulf %77, %81 : vector<8x64xf32>
    %c0_30 = arith.constant 0 : index
    %c4 = arith.constant 4 : index
    %c0_31 = arith.constant 0 : index
    %83 = vector.load %arg4[%c0_30, %c4, %c0_31] : memref<1x8x64xf32, #tpu.memory_space<vmem>>, vector<1x1x64xf32>
    %84 = vector.shape_cast %83 : vector<1x1x64xf32> to vector<64xf32>
    %85 = vector.shape_cast %84 : vector<64xf32> to vector<1x64xf32>
    %86 = vector.broadcast %85 : vector<1x64xf32> to vector<8x64xf32>
    %87 = arith.addf %82, %86 : vector<8x64xf32>
    %88 = arith.addf %3, %87 : vector<8x64xf32>
    %c0_32 = arith.constant 0 : index
    %c2 = arith.constant 2 : index
    %c0_33 = arith.constant 0 : index
    %89 = vector.load %arg4[%c0_32, %c2, %c0_33] : memref<1x8x64xf32, #tpu.memory_space<vmem>>, vector<1x1x64xf32>
    %90 = vector.shape_cast %89 : vector<1x1x64xf32> to vector<64xf32>
    %c0_34 = arith.constant 0 : index
    %c3 = arith.constant 3 : index
    %c0_35 = arith.constant 0 : index
    %91 = vector.load %arg4[%c0_34, %c3, %c0_35] : memref<1x8x64xf32, #tpu.memory_space<vmem>>, vector<1x1x64xf32>
    %92 = vector.shape_cast %91 : vector<1x1x64xf32> to vector<64xf32>
    %cst_36 = arith.constant dense<0.000000e+00> : vector<8xf32>
    %93 = vector.multi_reduction <add>, %88, %cst_36 [1] : vector<8x64xf32> to vector<8xf32>
    %94 = vector.shape_cast %93 : vector<8xf32> to vector<8x1xf32>
    %cst_37 = arith.constant 6.400000e+01 : f32
    %95 = vector.broadcast %cst_37 : f32 to vector<8x1xf32>
    %96 = arith.divf %94, %95 : vector<8x1xf32>
    %97 = vector.broadcast %96 : vector<8x1xf32> to vector<8x64xf32>
    %98 = arith.subf %88, %97 : vector<8x64xf32>
    %99 = arith.mulf %98, %98 : vector<8x64xf32>
    %cst_38 = arith.constant dense<0.000000e+00> : vector<8xf32>
    %100 = vector.multi_reduction <add>, %99, %cst_38 [1] : vector<8x64xf32> to vector<8xf32>
    %101 = vector.shape_cast %100 : vector<8xf32> to vector<8x1xf32>
    %cst_39 = arith.constant 6.400000e+01 : f32
    %102 = vector.broadcast %cst_39 : f32 to vector<8x1xf32>
    %103 = arith.divf %101, %102 : vector<8x1xf32>
    %104 = vector.broadcast %96 : vector<8x1xf32> to vector<8x64xf32>
    %105 = arith.subf %88, %104 : vector<8x64xf32>
    %cst_40 = arith.constant 9.99999974E-6 : f32
    %106 = vector.broadcast %cst_40 : f32 to vector<8x1xf32>
    %107 = arith.addf %103, %106 : vector<8x1xf32>
    %108 = math.rsqrt %107 : vector<8x1xf32>
    %109 = vector.broadcast %108 : vector<8x1xf32> to vector<8x64xf32>
    %110 = arith.mulf %105, %109 : vector<8x64xf32>
    %111 = vector.shape_cast %90 : vector<64xf32> to vector<1x64xf32>
    %112 = vector.broadcast %111 : vector<1x64xf32> to vector<8x64xf32>
    %113 = arith.mulf %110, %112 : vector<8x64xf32>
    %114 = vector.shape_cast %92 : vector<64xf32> to vector<1x64xf32>
    %115 = vector.broadcast %114 : vector<1x64xf32> to vector<8x64xf32>
    %116 = arith.addf %113, %115 : vector<8x64xf32>
    %117 = arith.truncf %116 : vector<8x64xf32> to vector<8x64xbf16>
    %c0_41 = arith.constant 0 : index
    %c0_42 = arith.constant 0 : index
    %c0_43 = arith.constant 0 : index
    %118 = vector.load %arg9[%c0_41, %c0_42, %c0_43] : memref<1x64x256xi8, #tpu.memory_space<vmem>>, vector<1x64x256xi8>
    %119 = vector.shape_cast %118 : vector<1x64x256xi8> to vector<64x256xi8>
    %120 = arith.sitofp %119 : vector<64x256xi8> to vector<64x256xbf16>
    %cst_44 = arith.constant dense<0.000000e+00> : vector<8x256xf32>
    %121 = tpu.matmul %117, %120, %cst_44 {dimension_numbers = #tpu.dot_dimension_numbers<[1], [0], [0], [1], [0, 0, 1, 1], [], []>} : vector<8x64xbf16>, vector<64x256xbf16>, vector<8x256xf32> -> vector<8x256xf32>
    %c0_45 = arith.constant 0 : index
    %c1_46 = arith.constant 1 : index
    %c0_47 = arith.constant 0 : index
    %122 = vector.load %arg5[%c0_45, %c1_46, %c0_47] : memref<1x2x256xf32, #tpu.memory_space<vmem>>, vector<1x1x256xf32>
    %123 = vector.shape_cast %122 : vector<1x1x256xf32> to vector<256xf32>
    %124 = vector.shape_cast %123 : vector<256xf32> to vector<1x256xf32>
    %125 = vector.broadcast %124 : vector<1x256xf32> to vector<8x256xf32>
    %126 = arith.mulf %121, %125 : vector<8x256xf32>
    %c0_48 = arith.constant 0 : index
    %c0_49 = arith.constant 0 : index
    %c0_50 = arith.constant 0 : index
    %127 = vector.load %arg5[%c0_48, %c0_49, %c0_50] : memref<1x2x256xf32, #tpu.memory_space<vmem>>, vector<1x1x256xf32>
    %128 = vector.shape_cast %127 : vector<1x1x256xf32> to vector<256xf32>
    %129 = vector.shape_cast %128 : vector<256xf32> to vector<1x256xf32>
    %130 = vector.broadcast %129 : vector<1x256xf32> to vector<8x256xf32>
    %131 = arith.addf %126, %130 : vector<8x256xf32>
    %132 = arith.mulf %131, %131 : vector<8x256xf32>
    %133 = arith.mulf %131, %132 : vector<8x256xf32>
    %cst_51 = arith.constant 4.471500e-02 : f32
    %134 = vector.broadcast %cst_51 : f32 to vector<8x256xf32>
    %135 = arith.mulf %134, %133 : vector<8x256xf32>
    %136 = arith.addf %131, %135 : vector<8x256xf32>
    %cst_52 = arith.constant 0.797884583 : f32
    %137 = vector.broadcast %cst_52 : f32 to vector<8x256xf32>
    %138 = arith.mulf %137, %136 : vector<8x256xf32>
    %139 = math.tanh %138 : vector<8x256xf32>
    %cst_53 = arith.constant 1.000000e+00 : f32
    %140 = vector.broadcast %cst_53 : f32 to vector<8x256xf32>
    %141 = arith.addf %140, %139 : vector<8x256xf32>
    %cst_54 = arith.constant 5.000000e-01 : f32
    %142 = vector.broadcast %cst_54 : f32 to vector<8x256xf32>
    %143 = arith.mulf %142, %141 : vector<8x256xf32>
    %144 = arith.mulf %131, %143 : vector<8x256xf32>
    %145 = arith.truncf %144 : vector<8x256xf32> to vector<8x256xbf16>
    %c0_55 = arith.constant 0 : index
    %c0_56 = arith.constant 0 : index
    %c0_57 = arith.constant 0 : index
    %146 = vector.load %arg10[%c0_55, %c0_56, %c0_57] : memref<1x256x64xi8, #tpu.memory_space<vmem>>, vector<1x256x64xi8>
    %147 = vector.shape_cast %146 : vector<1x256x64xi8> to vector<256x64xi8>
    %148 = arith.sitofp %147 : vector<256x64xi8> to vector<256x64xbf16>
    %cst_58 = arith.constant dense<0.000000e+00> : vector<8x64xf32>
    %149 = tpu.matmul %145, %148, %cst_58 {dimension_numbers = #tpu.dot_dimension_numbers<[1], [0], [0], [1], [0, 0, 1, 1], [], []>} : vector<8x256xbf16>, vector<256x64xbf16>, vector<8x64xf32> -> vector<8x64xf32>
    %c0_59 = arith.constant 0 : index
    %c7 = arith.constant 7 : index
    %c0_60 = arith.constant 0 : index
    %150 = vector.load %arg4[%c0_59, %c7, %c0_60] : memref<1x8x64xf32, #tpu.memory_space<vmem>>, vector<1x1x64xf32>
    %151 = vector.shape_cast %150 : vector<1x1x64xf32> to vector<64xf32>
    %152 = vector.shape_cast %151 : vector<64xf32> to vector<1x64xf32>
    %153 = vector.broadcast %152 : vector<1x64xf32> to vector<8x64xf32>
    %154 = arith.mulf %149, %153 : vector<8x64xf32>
    %c0_61 = arith.constant 0 : index
    %c5 = arith.constant 5 : index
    %c0_62 = arith.constant 0 : index
    %155 = vector.load %arg4[%c0_61, %c5, %c0_62] : memref<1x8x64xf32, #tpu.memory_space<vmem>>, vector<1x1x64xf32>
    %156 = vector.shape_cast %155 : vector<1x1x64xf32> to vector<64xf32>
    %157 = vector.shape_cast %156 : vector<64xf32> to vector<1x64xf32>
    %158 = vector.broadcast %157 : vector<1x64xf32> to vector<8x64xf32>
    %159 = arith.addf %154, %158 : vector<8x64xf32>
    %160 = arith.addf %88, %159 : vector<8x64xf32>
    %c0_63 = arith.constant 0 : index
    %c0_64 = arith.constant 0 : index
    %161 = vector.load %arg11[%c0_63, %c0_64] : memref<8x64xf32, #tpu.memory_space<vmem>>, vector<8x64xf32>
    tpu.vector_store %arg11[%c0_63, %c0_64], %160 {strides = array<i32>} : memref<8x64xf32, #tpu.memory_space<vmem>>, vector<8x64xf32>,
    %c1_i32 = arith.constant 1 : i32
    %162 = arith.cmpi eq, %arg0, %c1_i32 : i32
    %163 = arith.extui %162 : i1 to i32
    %c0_i32_65 = arith.constant 0 : i32
    %164 = arith.cmpi ne, %163, %c0_i32_65 : i32
    scf.if %164 {
      %c0_66 = arith.constant 0 : index
      %c0_67 = arith.constant 0 : index
      %165 = vector.load %arg3[%c0_66, %c0_67] : memref<2x64xf32, #tpu.memory_space<vmem>>, vector<1x64xf32>
      %166 = vector.shape_cast %165 : vector<1x64xf32> to vector<64xf32>
      %c1_68 = arith.constant 1 : index
      %c0_69 = arith.constant 0 : index
      %167 = vector.load %arg3[%c1_68, %c0_69] : memref<2x64xf32, #tpu.memory_space<vmem>>, vector<1x64xf32>
      %168 = vector.shape_cast %167 : vector<1x64xf32> to vector<64xf32>
      %cst_70 = arith.constant dense<0.000000e+00> : vector<8xf32>
      %169 = vector.multi_reduction <add>, %160, %cst_70 [1] : vector<8x64xf32> to vector<8xf32>
      %170 = vector.shape_cast %169 : vector<8xf32> to vector<8x1xf32>
      %cst_71 = arith.constant 6.400000e+01 : f32
      %171 = vector.broadcast %cst_71 : f32 to vector<8x1xf32>
      %172 = arith.divf %170, %171 : vector<8x1xf32>
      %173 = vector.broadcast %172 : vector<8x1xf32> to vector<8x64xf32>
      %174 = arith.subf %160, %173 : vector<8x64xf32>
      %175 = arith.mulf %174, %174 : vector<8x64xf32>
      %cst_72 = arith.constant dense<0.000000e+00> : vector<8xf32>
      %176 = vector.multi_reduction <add>, %175, %cst_72 [1] : vector<8x64xf32> to vector<8xf32>
      %177 = vector.shape_cast %176 : vector<8xf32> to vector<8x1xf32>
      %cst_73 = arith.constant 6.400000e+01 : f32
      %178 = vector.broadcast %cst_73 : f32 to vector<8x1xf32>
      %179 = arith.divf %177, %178 : vector<8x1xf32>
      %180 = vector.broadcast %172 : vector<8x1xf32> to vector<8x64xf32>
      %181 = arith.subf %160, %180 : vector<8x64xf32>
      %cst_74 = arith.constant 9.99999974E-6 : f32
      %182 = vector.broadcast %cst_74 : f32 to vector<8x1xf32>
      %183 = arith.addf %179, %182 : vector<8x1xf32>
      %184 = math.rsqrt %183 : vector<8x1xf32>
      %185 = vector.broadcast %184 : vector<8x1xf32> to vector<8x64xf32>
      %186 = arith.mulf %181, %185 : vector<8x64xf32>
      %187 = vector.shape_cast %166 : vector<64xf32> to vector<1x64xf32>
      %188 = vector.broadcast %187 : vector<1x64xf32> to vector<8x64xf32>
      %189 = arith.mulf %186, %188 : vector<8x64xf32>
      %190 = vector.shape_cast %168 : vector<64xf32> to vector<1x64xf32>
      %191 = vector.broadcast %190 : vector<1x64xf32> to vector<8x64xf32>
      %192 = arith.addf %189, %191 : vector<8x64xf32>
      %c0_75 = arith.constant 0 : index
      %c0_76 = arith.constant 0 : index
      %193 = vector.load %arg11[%c0_75, %c0_76] : memref<8x64xf32, #tpu.memory_space<vmem>>, vector<8x64xf32>
      tpu.vector_store %arg11[%c0_75, %c0_76], %192 {strides = array<i32>} : memref<8x64xf32, #tpu.memory_space<vmem>>, vector<8x64xf32>,
    } else {
    }
    return
  }
  func.func @transform_0(%arg0: i32, %arg1: memref<1xi32, #tpu.memory_space<smem>>) -> (i32, i32) {
    %c0_i32 = arith.constant 0 : i32
    %c0_i32_0 = arith.constant 0 : i32
    %c0_i32_1 = arith.constant 0 : i32
    return %c0_i32, %c0_i32_0 : i32, i32
  }
  func.func @transform_1(%arg0: i32, %arg1: memref<1xi32, #tpu.memory_space<smem>>) -> (i32, i32) {
    %c0_i32 = arith.constant 0 : i32
    %c0_i32_0 = arith.constant 0 : i32
    %c0_i32_1 = arith.constant 0 : i32
    return %c0_i32, %c0_i32_0 : i32, i32
  }
  func.func @transform_2(%arg0: i32, %arg1: memref<1xi32, #tpu.memory_space<smem>>) -> (i32, i32, i32) {
    %c0_i32 = arith.constant 0 : i32
    %c0_i32_0 = arith.constant 0 : i32
    %c0_i32_1 = arith.constant 0 : i32
    return %arg0, %c0_i32, %c0_i32_0 : i32, i32, i32
  }
  func.func @transform_3(%arg0: i32, %arg1: memref<1xi32, #tpu.memory_space<smem>>) -> (i32, i32, i32) {
    %c0_i32 = arith.constant 0 : i32
    %c0_i32_0 = arith.constant 0 : i32
    %c0_i32_1 = arith.constant 0 : i32
    return %arg0, %c0_i32, %c0_i32_0 : i32, i32, i32
  }
  func.func @transform_4(%arg0: i32, %arg1: memref<1xi32, #tpu.memory_space<smem>>) -> (i32, i32, i32) {
    %c0_i32 = arith.constant 0 : i32
    %c0_i32_0 = arith.constant 0 : i32
    %c0_i32_1 = arith.constant 0 : i32
    return %arg0, %c0_i32, %c0_i32_0 : i32, i32, i32
  }
  func.func @transform_5(%arg0: i32, %arg1: memref<1xi32, #tpu.memory_space<smem>>) -> (i32, i32, i32) {
    %c0_i32 = arith.constant 0 : i32
    %c0_i32_0 = arith.constant 0 : i32
    %c0_i32_1 = arith.constant 0 : i32
    return %arg0, %c0_i32, %c0_i32_0 : i32, i32, i32
  }
  func.func @transform_6(%arg0: i32, %arg1: memref<1xi32, #tpu.memory_space<smem>>) -> (i32, i32, i32) {
    %c0_i32 = arith.constant 0 : i32
    %c0_i32_0 = arith.constant 0 : i32
    %c0_i32_1 = arith.constant 0 : i32
    return %arg0, %c0_i32, %c0_i32_0 : i32, i32, i32
  }
  func.func @transform_7(%arg0: i32, %arg1: memref<1xi32, #tpu.memory_space<smem>>) -> (i32, i32, i32) {
    %c0_i32 = arith.constant 0 : i32
    %c0_i32_0 = arith.constant 0 : i32
    %c0_i32_1 = arith.constant 0 : i32
    return %arg0, %c0_i32, %c0_i32_0 : i32, i32, i32
  }
  func.func @transform_8(%arg0: i32, %arg1: memref<1xi32, #tpu.memory_space<smem>>) -> (i32, i32, i32) {
    %c0_i32 = arith.constant 0 : i32
    %c0_i32_0 = arith.constant 0 : i32
    %c0_i32_1 = arith.constant 0 : i32
    return %arg0, %c0_i32, %c0_i32_0 : i32, i32, i32
  }
  func.func @transform_9(%arg0: i32, %arg1: memref<1xi32, #tpu.memory_space<smem>>) -> (i32, i32) {
    %c0_i32 = arith.constant 0 : i32
    %c0_i32_0 = arith.constant 0 : i32
    %c0_i32_1 = arith.constant 0 : i32
    return %c0_i32, %c0_i32_0 : i32, i32
  }
}

</mosaic_0001>

<bundles_post_ra>
// kernel: tpu_custom_call.1
= control target key start
LH: loop header
LB: loop body
LE: loop exit
PB: predicated region body
PF: predicated region fallthrough
CT: control target
= control target key end

     0   :  { %s2848_s0 = inlined_call_operand.<no memory space> [shape: s32[1], index: 0, kind: input, shape index: {}]   ;;  %s2849_s1 = inlined_call_operand.hbm [shape: f32[8,64], index: 1, kind: input, shape index: {}, may-alias: {1,10}]   ;;  %s2850_s2 = inlined_call_operand.vmem [shape: f32[2,64], index: 2, kind: input, shape index: {}]   ;;  %s2851_s3 = inlined_call_operand.vmem [shape: f32[2,8,64], index: 3, kind: input, shape index: {}]   ;;  %s2852_s4 = inlined_call_operand.vmem [shape: f32[2,2,256], index: 4, kind: input, shape index: {}]   ;;  %s2853_s5 = inlined_call_operand.vmem [shape: f32[2,1,192], index: 5, kind: input, shape index: {}]   ;;  %s2854_s6 = inlined_call_operand.vmem [shape: s8[2,64,192], index: 6, kind: input, shape index: {}]   ;;  %s2855_s7 = inlined_call_operand.vmem [shape: s8[2,64,64], index: 7, kind: input, shape index: {}]   ;;  %s2856_s8 = inlined_call_operand.vmem [shape: s8[2,64,256], index: 8, kind: input, shape index: {}]   ;;  %s2857_s9 = inlined_call_operand.vmem [shape: s8[2,256,64], index: 9, kind: input, shape index: {}]   ;;  %s2858_s10 = inlined_call_operand.hbm [shape: f32[8,64], index: 10, kind: output, shape index: {}, may-alias: {1,10}]  }
   0x1   :  { %15 = sst [smem:[#allocation3]] %s2848_s0 }
   0x2   :  { %16 = vsyncpa [#allocation5], 0 }
   0x3   :  { %17 = vsyncpa [#allocation6], 0  ;;  %s2612_s15 = smov 0  }
   0x4 LB: > { %s2618_s16 = sadd.s32 4294967295, %s2538_s15   ;;  %p2239_p0 = scmp.ge.s32.totalorder %s2538_s15, 1  ;;  %s2538_s15 = sphi %s2612_s15, %s23_s15  }
   0x5   : > { %p273_p1 = scmp.lt.s32.totalorder %s2538_s15, 3  ;;  %p2240_p2 = scmp.ne.s32.totalorder %s2618_s16, 0 }
   0x6   : > { %p2422_p4 = scmp.eq.s32.totalorder %s2618_s16, 0  ;;  %s2540_s17 = smov [#allocation4]  }
   0x7   : > { %p2623_p3 = pnand %p2239_p0, %p273_p1  ;;  %s286_s18 = sshll.u32 %s2540_s17, 4  ;;  %s287_s18 = int_to_ptr.vmem [resolvable:$true] %s286_s18 }
   0x8   : > { %s2485_s19 = scalar_lea.vmem %s287_s18, 128  ;;  %p2493_p11 = scmp.lt.s32.totalorder %s287_s18, %s287_s18 }
   0x9   : > { %p2418_p5 = pneg %p2623_p3  ;;  %p2486_p8 = scmp.ne.s32.totalorder %s287_s18, %s2485_s19 }
   0xa   : > { %p2494_p12 = scmp.lt.s32.totalorder %s2485_s19, %s2485_s19 }
   0xb   : > { %p2419_p6 = pnand %p2422_p4, %p2418_p5 }
   0xc   : > { %p2495_p13 = por %p2494_p12, %p2493_p11 }
   0xd   : > { %p2476_p7 = pneg %p2419_p6 }
   0xf   : > { %p2488_p9 = pnand %p2486_p8, %p2476_p7 }
  0x11   : > { %p2489_p10 = pneg %p2488_p9 }
  0x13   : > { %p2496_p0 = pnand %p2495_p13, %p2489_p10 }
  0x15   : > { %2499 = shalt.err (!%p2496_p0)
}
  0x16   : > { %2421 = dma.hbm_to_vmem [thread:$0]  (!%p2419_p6), %s2849_s1, 128, %s287_s18, [#allocation5]  }
  0x17   : > { %356 = sbr.rel (%p2623_p3) target bundleno = 3199 (0xc7f), region = 56 }
  0x1c   : > { %2529 = dma.done.wait (%p2422_p4), [#allocation5], 128  }
  0x1d   : > { %2531 = vsyncadd (%p2422_p4), [#allocation5], 4294967168  ;;  %p415_p1 = scmp.lt.s32.totalorder %s2618_s16, 1 }
  0x1f   : > { %s416_s22 = scalar_select %p415_p1, %s2618_s16, 1 }
  0x21   : > { %s2244_s23 = sshll.u32 %s416_s22, 3  ;;  %s2294_s24 = sshll.u32 %s416_s22, 2 }
  0x22   : > { %s2646_s27 = scalar_lea.vmem %s2851_s3, %s2244_s23  ;;  %s2651_s30 = scalar_lea.vmem %s2852_s4, %s2294_s24 }
  0x23   : > { %s2247_s11 = sshll.u32 %s416_s22, 1  ;;  %s2295_s12 = sshll.u32 %s416_s22, 5 }
  0x24   : > { %s2656_s0 = scalar_lea.vmem %s2853_s5, %s2247_s11  ;;  %s2661_s19 = scalar_lea.vmem %s2854_s6, %s2295_s12 }
  0x25   : > { %s2296_s20 = sshll.u32 %s416_s22, 4  ;;  %s2666_s25 = scalar_lea.vmem %s2856_s8, %s2295_s12 }
  0x26   : > { %s2671_s28 = scalar_lea.vmem %s2855_s7, %s2296_s20  ;;  %s2298_s29 = sshll.u32 %s416_s22, 6 }
  0x27   : > { %s2676_s14 = scalar_lea.vmem %s2857_s9, %s2298_s29  ;;  %452 = sbr.rel (%p2240_p2) target bundleno = 46 (0x2e), region = 64 }
  0x2c   : > { %v453_v0 = vld [vmem:[#allocation4] sm:$0xff]  ;;  %vm454_vm0 = vcmask 523264  }
  0x2d   : > { %455 = vst.msk [vmem:[#allocation7] sm:$0xff] %vm454_vm0, %v453_v0 }
  0x2e PF: > { %vm459_vm1 = vcmask 523264   ;;  %v488_v8 = vld [vmem:[%s2661_s19 + $0x18] sm:$0xff]  ;;  %v487_v9 = vld [vmem:[%s2661_s19 + $0x10] sm:$0xff]  ;;  %v2541_v13 = vmov 0   ;;  %v486_v14 = vld [vmem:[%s2661_s19 + $0x8] sm:$0xff]  ;;  %v543_v31 = vlaneseq  ;;  %s2542_s22 = smov 80  }
  0x2f   : > { %v494_v10 = vunpack.c.l.s8.bf16 %v488_v8  ;;  %v496_v11 = vunpack.c.h.s8.bf16 %v488_v8  ;;  %v495_v12 = vunpack.c.h.s8.bf16 %v487_v9  ;;  %532 = vmatprep.mubr.bf16.mxu0 %v2541_v13  ;;  %v493_v15 = vunpack.c.l.s8.bf16 %v487_v9  ;;  %v485_v17 = vld [vmem:[%s2661_s19] sm:$0xff]  ;;  %s2543_s12 = smov 112   ;;  %s2545_s17 = smov 64  }
  0x30   : > { %v492_v16 = vunpack.c.h.s8.bf16 %v486_v14  ;;  %v491_v18 = vunpack.c.h.s8.bf16 %v485_v17  ;;  %v490_v19 = vunpack.c.l.s8.bf16 %v486_v14  ;;  %v489_v20 = vunpack.c.l.s8.bf16 %v485_v17  ;;  %v2257_v25 = vld [vmem:[%s2646_s27] ss:$0 sm:$0xff]  ;;  %v2258_v27 = vld [vmem:[%s2646_s27 + $0x1] ss:$0 sm:$0xff]  ;;  %s577_s18 = sld [smem:[#allocation3]]  ;;  %s2550_s19 = smov 32  }
  0x31   : > { %508 = vmatprep.subr.bf16.mxu0 %v496_v11  ;;  %v2695_v32 = vshrl.u32 %v543_v31, 7  ;;  %v541_v34 = vld [vmem:[%s2656_s0] sm:$0x3]  ;;  %s2544_s0 = smov 96   ;;  %v2546_v47 = vmov 0.0   ;;  %vm2547_vm2 = vmmov 0  }
  0x32   : > { %509 = vmatpush1.bf16.msra.mxu0 %v495_v12  ;;  %2350 = vmatprep.subr.mxu1 %v2546_v47  ;;  %vm721_vm3 = vcmask 130048   ;;  %v575_v60 = vand.u32 127, %v543_v31  ;;  %vm1016_vm7 = vcmask 64512   ;;  %s2551_s20 = smov 16   ;;  %s2552_s21 = smov 48   ;;  %vm1802_vm8 = vcmask 261120  }
  0x33   : > { %510 = vmatprep.subr.bf16.mxu0 %v494_v10  ;;  %v2698_v33 = vsub.s32 0, %v2695_v32  ;;  %v2702_v35 = vsub.s32 1, %v2695_v32  ;;  %2354 = vmatprep.mubr.msk.f32.mxu1 %vm2547_vm2, %v2546_v47  ;;  %vm1804_vm9 = vcmask 392192   ;;  %p2287_p2 = scmp.ne.s32.totalorder %s2618_s16, 1 }
  0x34   : > { %v2680_v1 = vld [vmem:[#allocation7] sm:$0xff]  ;;  %vm576_vm4 = vcmp.le.s32.totalorder %v575_v60, %v2695_v32 }
  0x35   : > { %v460_v2 = vsel %vm459_vm1, %v2680_v1, 0.0  ;;  %v546_v36 = vrot.slane %v541_v34, %v2698_v33  ;;  %v550_v37 = vrot.slane %v541_v34, %v2702_v35 }
  0x36   : > { %461 = vadd.xlane.f32.xlu0 %v460_v2  ;;  %511 = vmatpush1.bf16.msra.mxu0 %v493_v15  ;;  %v578_v61 = vstv %s577_s18 }
  0x37   : > { %512 = vmatprep.subr.bf16.mxu0 %v492_v16  ;;  %vm579_vm5 = vcmp.lt.s32.totalorder %v575_v60, %v578_v61 }
  0x38   : > { %vm2733_vm6 = vmand %vm576_vm4, %vm579_vm5 }
  0x3a   : > { %513 = vmatpush1.bf16.msra.mxu0 %v491_v18 }
  0x3b   : > { %514 = vmatprep.subr.bf16.mxu0 %v490_v19 }
  0x3e   : > { %515 = vmatpush1.bf16.msra.mxu0 %v489_v20 }
  0xbf   : > { %v462_v3 = vpop.xlane.xlu0 %461 }
  0xc0   : > { %v464_v4 = vmul.f32 0.015625, %v462_v3 }
  0xc2   : > { %v465_v5 = vsub.f32 %v2680_v1, %v464_v4 }
  0xc4   : > { %v466_v6 = vmul.f32 %v465_v5, %v465_v5 }
  0xc6   : > { %v467_v7 = vsel %vm459_vm1, %v466_v6, 0.0 }
  0xc7   : > { %468 = vadd.xlane.f32.xlu0 %v467_v7 }
 0x150   : > { %v469_v21 = vpop.xlane.xlu0 %468 }
 0x151   : > { %v470_v22 = vmul.f32 0.015625, %v469_v21 }
 0x153   : > { %v471_v23 = vadd.f32 1e-05, %v470_v22 }
 0x155   : > { %2448 = vrsqrt.f32 %v471_v23 }
 0x162   : > { %v2449_v24 = vpop.eup %2448 }
 0x163   : > { %v473_v26 = vmul.f32 %v2449_v24, %v465_v5 }
 0x165   : > { %v478_v28 = vmul.f32 %v2257_v25, %v473_v26 }
 0x167   : > { %v483_v29 = vadd.f32 %v2258_v27, %v478_v28 }
 0x169   : > { %v484_v30 = vpack.c.bf16 %v483_v29, %v483_v29 }
 0x16b   : > { %2259 = vmatmul.mubr.msk.bf16.vlgmr.msra.gmra.mxu0 %vm459_vm1, %v484_v30 }
 0x22b   : > { %v534_v38 = vpop.f32.mrf.mxu0 }
 0x22c   : > { %v553_v39 = vmul.f32 %v546_v36, %v534_v38 }
 0x22d   : > { %v536_v40 = vpop.f32.mrf.mxu0 }
 0x22e   : > { %v2706_v41 = vmul.f32 %v550_v37, %v536_v40  ;;  %560 = vrot.lane.b32.xlu0 %v553_v39, %s2542_s22  ;;  %556 = vrot.lane.b32.xlu1 %v553_v39, %s2543_s12 }
 0x22f   : > { %v538_v42 = vpop.f32.mrf.mxu0 }
 0x231   : > { %v539_v43 = vpop.f32.mrf.mxu0 }
 0x232   : > { %558 = vrot.lane.b32.xlu1 %v553_v39, %s2544_s0 }
 0x236   : > { %581 = vrot.lane.b32.xlu1 %v553_v39, %s2545_s17 }
 0x2a0   : > { %v557_v44 = vpop.permute.xlu1 %556  ;;  %v561_v46 = vpop.permute.xlu0 %560 }
 0x2a1   : > { %583 = vrot.lane.b32.xlu1 %v557_v44, %s2545_s17 }
 0x2a4   : > { %v559_v45 = vpop.permute.xlu1 %558 }
 0x2a5   : > { %585 = vrot.lane.b32.xlu1 %v559_v45, %s2545_s17 }
 0x2a8   : > { %v582_v48 = vpop.permute.xlu1 %581 }
 0x2a9   : > { %587 = vrot.lane.b32.xlu1 %v561_v46, %s2545_s17 }
 0x2d2   : > { %593 = vxpose.xlu1.b32.start.end [1/1] (short) (narrow) %v582_v48, 16 }
 0x313   : > { %v584_v49 = vpop.permute.xlu1 %583 }
 0x314   : > { %625 = vxpose.xlu0.b32.start.end [1/1] (short) (narrow) %v584_v49, 16 }
 0x317   : > { %v586_v50 = vpop.permute.xlu1 %585 }
 0x319   : > { %657 = vxpose.xlu0.b32.start.end [1/1] (short) (narrow) %v586_v50, 16 }
 0x31b   : > { %v588_v51 = vpop.permute.xlu1 %587 }
 0x31e   : > { %689 = vxpose.xlu0.b32.start.end [1/1] (short) (narrow) %v588_v51, 16 }
 0x34e   : > { %v609_v52 = vpop.trf.xlu1 }
 0x352   : > { %v610_v53 = vpop.trf.xlu1 }
 0x353   : > { %2351 = vmatpush3.msra.mxu1 %v610_v53 }
 0x354   : > { %2352 = vmatprep.subr.mxu1 %v2546_v47 }
 0x355   : > { %2353 = vmatpush3.msra.mxu1 %v609_v52 }
 0x356   : > { %2355 = vmatmul.mubr.msk.f32.vlgmr.msra.gmra.mxu1 %vm721_vm3, %v553_v39  ;;  %2357 = vmatprep.subr.mxu1 %v2546_v47 }
 0x357   : > { %2361 = vmatprep.mubr.msk.f32.mxu1 %vm2547_vm2, %v2546_v47 }
 0x390   : > { %v641_v54 = vpop.trf.xlu0 }
 0x394   : > { %v642_v55 = vpop.trf.xlu0 }
 0x395   : > { %2358 = vmatpush3.msra.mxu1 %v642_v55 }
 0x396   : > { %2359 = vmatprep.subr.mxu1 %v2546_v47 }
 0x397   : > { %2360 = vmatpush3.msra.mxu1 %v641_v54 }
 0x398   : > { %v673_v56 = vpop.trf.xlu0  ;;  %2362 = vmatmul.mubr.msk.f32.vlgmr.msra.gmra.mxu1 %vm721_vm3, %v557_v44  ;;  %2364 = vmatprep.subr.mxu1 %v2546_v47 }
 0x399   : > { %2368 = vmatprep.mubr.msk.f32.mxu1 %vm2547_vm2, %v2546_v47 }
 0x39c   : > { %v674_v57 = vpop.trf.xlu0 }
 0x39d   : > { %2365 = vmatpush3.msra.mxu1 %v674_v57 }
 0x39e   : > { %2366 = vmatprep.subr.mxu1 %v2546_v47 }
 0x39f   : > { %2367 = vmatpush3.msra.mxu1 %v673_v56 }
 0x3a0   : > { %v705_v58 = vpop.trf.xlu0  ;;  %2369 = vmatmul.mubr.msk.f32.vlgmr.msra.gmra.mxu1 %vm721_vm3, %v559_v45  ;;  %2371 = vmatprep.subr.mxu1 %v2546_v47 }
 0x3a1   : > { %2375 = vmatprep.mubr.msk.f32.mxu1 %vm2547_vm2, %v2546_v47 }
 0x3a4   : > { %v706_v59 = vpop.trf.xlu0 }
 0x3a5   : > { %2372 = vmatpush3.msra.mxu1 %v706_v59 }
 0x3a6   : > { %2373 = vmatprep.subr.mxu1 %v2546_v47 }
 0x3a7   : > { %2374 = vmatpush3.msra.mxu1 %v705_v58 }
 0x3a8   : > { %2376 = vmatmul.mubr.msk.f32.vlgmr.msra.gmra.mxu1 %vm721_vm3, %v561_v46 }
 0x416   : > { %v790_v63 = vpop.f32.mrf.mxu1 }
 0x417   : > { %v1012_v0 = vsel %vm2733_vm6, %v790_v63, -3.4028235e+38 }
 0x418   : > { %v2356_v2 = vpop.f32.mrf.mxu1  ;;  %v1017_v3 = vsel %vm1016_vm7, %v1012_v0, -inf }
 0x419   : > { %1018 = vmax.xlane.f32.xlu1 %v1017_v3 }
 0x458   : > { %v862_v4 = vpop.f32.mrf.mxu1 }
 0x459   : > { %v1013_v5 = vsel %vm2733_vm6, %v862_v4, -3.4028235e+38 }
 0x45a   : > { %v2363_v6 = vpop.f32.mrf.mxu1  ;;  %v1020_v7 = vsel %vm1016_vm7, %v1013_v5, -inf }
 0x45b   : > { %1021 = vmax.xlane.f32.xlu0 %v1020_v7 }
 0x460   : > { %v934_v8 = vpop.f32.mrf.mxu1 }
 0x461   : > { %v1014_v9 = vsel %vm2733_vm6, %v934_v8, -3.4028235e+38 }
 0x462   : > { %v2370_v10 = vpop.f32.mrf.mxu1  ;;  %v1023_v11 = vsel %vm1016_vm7, %v1014_v9, -inf }
 0x463   : > { %1024 = vmax.xlane.f32.xlu1 %v1023_v11 }
 0x468   : > { %v1006_v12 = vpop.f32.mrf.mxu1 }
 0x469   : > { %v1015_v14 = vsel %vm2733_vm6, %v1006_v12, -3.4028235e+38  ;;  %v2548_v12 = vmov 1983009808  }
 0x46a   : > { %v2377_v15 = vpop.f32.mrf.mxu1  ;;  %v1026_v16 = vsel %vm1016_vm7, %v1015_v14, -inf }
 0x46b   : > { %1027 = vmax.xlane.f32.xlu1 %v1026_v16  ;;  %v2549_v16 = vmov 1934713408  }
 0x471   : > { %566 = vrot.lane.b32.xlu0 %v2706_v41, %s2544_s0 }
 0x47c   : > { %563 = vrot.lane.b32.xlu1 %v2706_v41, %s2543_s12 }
 0x480   : > { %569 = vrot.lane.b32.xlu1 %v2706_v41, %s2542_s22 }
 0x4a2   : > { %v1019_v17 = vpop.xlane.xlu1 %1018 }
 0x4a3   : > { %v1029_v18 = vsub.f32 %v1012_v0, %v1019_v17  ;;  %v1688_v17 = vunpack.c.l.s4 %v2549_v16 }
 0x4a5   : > { %v1033_v19 = vmul.f32 1.442695, %v1029_v18 }
 0x4a7   : > { %2450 = vpow2.f32 %v1033_v19 }
 0x4b4   : > { %v2451_v20 = vpop.eup %2450 }
 0x4b5   : > { %v1041_v21 = vsel %vm1016_vm7, %v2451_v20, 0.0 }
 0x4b6   : > { %1042 = vadd.xlane.f32.xlu0 %v1041_v21 }
 0x4e4   : > { %v1022_v22 = vpop.xlane.xlu0 %1021 }
 0x4e5   : > { %v1030_v23 = vsub.f32 %v1013_v5, %v1022_v22 }
 0x4e7   : > { %v1035_v24 = vmul.f32 1.442695, %v1030_v23 }
 0x4e8   : > { %v567_v42 = vpop.permute.xlu0 %566 }
 0x4e9   : > { %2452 = vpow2.f32 %v1035_v24 }
 0x4ec   : > { %v1025_v25 = vpop.xlane.xlu1 %1024 }
 0x4ed   : > { %v1031_v26 = vsub.f32 %v1014_v9, %v1025_v25  ;;  %v1808_v9 = vld [vmem:[%s2671_s28 + $0x8] sm:$0xff] }
 0x4ee   : > { %v1812_v10 = vunpack.c.h.s8.bf16 %v1808_v9  ;;  %v1811_v11 = vunpack.c.l.s8.bf16 %v1808_v9 }
 0x4ef   : > { %v1037_v27 = vmul.f32 1.442695, %v1031_v26 }
 0x4f1   : > { %2454 = vpow2.f32 %v1037_v27 }
 0x4f4   : > { %v1028_v28 = vpop.xlane.xlu1 %1027 }
 0x4f5   : > { %v1032_v29 = vsub.f32 %v1015_v14, %v1028_v28  ;;  %v1656_v14 = vunpack.c.l.s4 %v2548_v12  ;;  %v2280_v12 = vld [vmem:[%s2646_s27 + $0x4] ss:$0 sm:$0xff] }
 0x4f6   : > { %v2453_v30 = vpop.eup %2452 }
 0x4f7   : > { %v1039_v31 = vmul.f32 1.442695, %v1032_v29  ;;  %v1044_v34 = vsel %vm1016_vm7, %v2453_v30, 0.0  ;;  %v1657_v19 = vunpack.c.0.s8 %v1656_v14 }
 0x4f8   : > { %1045 = vadd.xlane.f32.xlu0 %v1044_v34  ;;  %v564_v40 = vpop.permute.xlu1 %563 }
 0x4f9   : > { %2456 = vpow2.f32 %v1039_v31  ;;  %v1660_v22 = vsub.s32 %v1657_v19, %v2695_v32 }
 0x4fc   : > { %v570_v43 = vpop.permute.xlu1 %569 }
 0x4fe   : > { %v2455_v36 = vpop.eup %2454 }
 0x4ff   : > { %v1047_v37 = vsel %vm1016_vm7, %v2455_v36, 0.0 }
 0x500   : > { %1048 = vadd.xlane.f32.xlu1 %v1047_v37 }
 0x506   : > { %v2457_v38 = vpop.eup %2456 }
 0x507   : > { %v1050_v39 = vsel %vm1016_vm7, %v2457_v38, 0.0 }
 0x508   : > { %1051 = vadd.xlane.f32.xlu0 %v1050_v39 }
 0x533   : > { %1061 = vxpose.xlu1.b32.start.end [1/1] (short) (narrow) %v2706_v41, 16 }
 0x535   : > { %1093 = vxpose.xlu0.b32.start.end [1/1] (short) (narrow) %v564_v40, 16 }
 0x538   : > { %1125 = vxpose.xlu1.b32.start.end [1/1] (short) (narrow) %v567_v42, 16 }
 0x53a   : > { %1157 = vxpose.xlu0.b32.start.end [1/1] (short) (narrow) %v570_v43, 16 }
 0x53f   : > { %v1043_v44 = vpop.xlane.xlu0 %1042 }
 0x540   : > { %2458 = vrcp.f32 %v1043_v44 }
 0x54d   : > { %v2459_v45 = vpop.eup %2458 }
 0x54e   : > { %v1057_v46 = vmul.f32 %v2459_v45, %v2451_v20  ;;  %v1689_v20 = vunpack.c.0.s8 %v1688_v17 }
 0x550   : > { %2378 = vmatprep.subr.msk.mxu1 %vm1016_vm7, %v1057_v46  ;;  %v1692_v28 = vsub.s32 %v1689_v20, %v2695_v32 }
 0x551   : > { %2379 = vmatpush3.xpose.msk.msra.mxu1 %vm1016_vm7, %v1057_v46 }
 0x581   : > { %v1046_v48 = vpop.xlane.xlu0 %1045 }
 0x582   : > { %2460 = vrcp.f32 %v1046_v48 }
 0x589   : > { %v1049_v49 = vpop.xlane.xlu1 %1048 }
 0x58a   : > { %2462 = vrcp.f32 %v1049_v49 }
 0x58f   : > { %v2461_v50 = vpop.eup %2460 }
 0x590   : > { %v1058_v51 = vmul.f32 %v2461_v50, %v2453_v30 }
 0x591   : > { %v1052_v41 = vpop.xlane.xlu0 %1051 }
 0x592   : > { %2464 = vrcp.f32 %v1052_v41  ;;  %2383 = vmatprep.subr.msk.mxu0 %vm1016_vm7, %v1058_v51 }
 0x593   : > { %2384 = vmatpush3.xpose.msk.msra.mxu0 %vm1016_vm7, %v1058_v51 }
 0x597   : > { %v2463_v52 = vpop.eup %2462 }
 0x598   : > { %v1059_v53 = vmul.f32 %v2463_v52, %v2455_v36  ;;  %v1807_v36 = vld [vmem:[%s2671_s28] sm:$0xff] }
 0x599   : > { %v1810_v42 = vunpack.c.h.s8.bf16 %v1807_v36  ;;  %v1809_v32 = vunpack.c.l.s8.bf16 %v1807_v36 }
 0x59a   : > { %2388 = vmatprep.subr.msk.mxu1 %vm1016_vm7, %v1059_v53 }
 0x59f   : > { %v2465_v54 = vpop.eup %2464 }
 0x5a0   : > { %v1060_v55 = vmul.f32 %v2465_v54, %v2457_v38 }
 0x5a2   : > { %2393 = vmatprep.subr.msk.mxu0 %vm1016_vm7, %v1060_v55 }
 0x5af   : > { %v1077_v56 = vpop.trf.xlu1 }
 0x5b0   : > { %2380 = vmatprep.mubr.msk.f32.mxu1 %vm1016_vm7, %v1077_v56 }
 0x5b1   : > { %v1109_v57 = vpop.trf.xlu0 }
 0x5b2   : > { %2385 = vmatprep.mubr.msk.f32.mxu0 %vm1016_vm7, %v1109_v57 }
 0x5b3   : > { %v1078_v58 = vpop.trf.xlu1 }
 0x5b4   : > { %2381 = vmatmul.mubr.msk.f32.vlgmr.msra.gmra.mxu1 %vm1016_vm7, %v1078_v58 }
 0x5b5   : > { %2389 = vmatpush3.xpose.msk.msra.mxu1 %vm1016_vm7, %v1059_v53  ;;  %v1110_v59 = vpop.trf.xlu0 }
 0x5b6   : > { %2386 = vmatmul.mubr.msk.f32.vlgmr.msra.gmra.mxu0 %vm1016_vm7, %v1110_v59 }
 0x5b7   : > { %2394 = vmatpush3.xpose.msk.msra.mxu0 %vm1016_vm7, %v1060_v55  ;;  %v1141_v60 = vpop.trf.xlu1 }
 0x5b8   : > { %2390 = vmatprep.mubr.msk.f32.mxu1 %vm1016_vm7, %v1141_v60  ;;  %2398 = vmatprep.subr.bf16.mxu0 %v2546_v47 }
 0x5b9   : > { %v1173_v61 = vpop.trf.xlu0 }
 0x5ba   : > { %2395 = vmatprep.mubr.msk.f32.mxu0 %vm1016_vm7, %v1173_v61 }
 0x5bb   : > { %v1142_v62 = vpop.trf.xlu1 }
 0x5bc   : > { %2391 = vmatmul.mubr.msk.f32.vlgmr.msra.gmra.mxu1 %vm1016_vm7, %v1142_v62 }
 0x5bd   : > { %v1174_v63 = vpop.trf.xlu0 }
 0x5be   : > { %2396 = vmatmul.mubr.msk.f32.vlgmr.msra.gmra.mxu0 %vm1016_vm7, %v1174_v63 }
 0x5bf   : > { %2406 = vmatprep.mubr.msk.bf16.mxu0 %vm2547_vm2, %v2546_v47  ;;  %2399 = vmatpush3.bf16.msra.mxu0 %v1812_v10  ;;  %v2279_v10 = vld [vmem:[%s2646_s27 + $0x6] ss:$0 sm:$0xff] }
 0x5c0   : > { %2400 = vmatprep.subr.bf16.mxu0 %v2546_v47 }
 0x5c3   : > { %2401 = vmatpush3.bf16.msra.mxu0 %v1811_v11 }
 0x5c4   : > { %2402 = vmatprep.subr.bf16.mxu0 %v2546_v47 }
 0x5c7   : > { %2403 = vmatpush3.bf16.msra.mxu0 %v1810_v42 }
 0x5c8   : > { %2404 = vmatprep.subr.bf16.mxu0 %v2546_v47 }
 0x5cb   : > { %2405 = vmatpush3.bf16.msra.mxu0 %v1809_v32 }
 0x674   : > { %v2382_v0 = vpop.f32.mrf.mxu1 }
 0x676   : > { %v1264_v2 = vpop.f32.mrf.mxu1  ;;  %v2387_v3 = vpop.f32.mrf.mxu0 }
 0x677   : > { %1525 = vxpose.xlu1.b32.start [1/2] (short) (narrow) %v1264_v2, 8 }
 0x678   : > { %v1348_v4 = vpop.f32.mrf.mxu0 }
 0x679   : > { %1557 = vxpose.xlu0.b32.start [1/2] (short) (narrow) %v1348_v4, 8 }
 0x67b   : > { %1526 = vxpose.xlu1.b32.end [2/2] (short) (narrow) %v2382_v0, 8 }
 0x67c   : > { %v2392_v5 = vpop.f32.mrf.mxu1 }
 0x67d   : > { %1558 = vxpose.xlu0.b32.end [2/2] (short) (narrow) %v2387_v3, 8 }
 0x67e   : > { %v1432_v6 = vpop.f32.mrf.mxu1  ;;  %v2397_v7 = vpop.f32.mrf.mxu0 }
 0x67f   : > { %1589 = vxpose.xlu1.b32.start [1/2] (short) (narrow) %v1432_v6, 8 }
 0x680   : > { %v1516_v8 = vpop.f32.mrf.mxu0 }
 0x681   : > { %1621 = vxpose.xlu0.b32.start [1/2] (short) (narrow) %v1516_v8, 8 }
 0x683   : > { %1590 = vxpose.xlu1.b32.end [2/2] (short) (narrow) %v2392_v5, 8 }
 0x685   : > { %1622 = vxpose.xlu0.b32.end [2/2] (short) (narrow) %v2397_v7, 8 }
 0x6f3   : > { %v1541_v15 = vpop.trf.xlu1 }
 0x6f5   : > { %v1573_v18 = vpop.trf.xlu0 }
 0x6fb   : > { %v1605_v21 = vpop.trf.xlu1 }
 0x6fc   : > { %v1653_v23 = vcombine.low %v1541_v15, %v1605_v21  ;;  %v1654_v24 = vcombine.high %v1541_v15, %v1605_v21 }
 0x6fd   : > { %v1637_v25 = vpop.trf.xlu0 }
 0x6fe   : > { %v1669_v26 = vcombine.low %v1573_v18, %v1637_v25  ;;  %v1670_v27 = vcombine.high %v1573_v18, %v1637_v25  ;;  %v1661_v29 = vrot.slane %v1653_v23, %v1660_v22  ;;  %v1668_v30 = vrot.slane %v1654_v24, %v1660_v22  ;;  %v1898_v25 = vld [vmem:[%s2666_s25 + $0x18] sm:$0xff] }
 0x700   : > { %v1677_v31 = vrot.slane %v1669_v26, %v1660_v22  ;;  %v1684_v34 = vrot.slane %v1670_v27, %v1660_v22  ;;  %v1906_v26 = vunpack.c.h.s8.bf16 %v1898_v25  ;;  %v1897_v27 = vld [vmem:[%s2666_s25 + $0x10] sm:$0xff] }
 0x702   : > { %v1685_v37 = vcombine.low %v1661_v29, %v1677_v31  ;;  %v1686_v38 = vcombine.high %v1661_v29, %v1677_v31  ;;  %v1701_v39 = vcombine.low %v1668_v30, %v1684_v34  ;;  %v1702_v40 = vcombine.high %v1668_v30, %v1684_v34  ;;  %1918 = vmatprep.subr.bf16.mxu0 %v1906_v26  ;;  %v1896_v30 = vld [vmem:[%s2666_s25 + $0x8] sm:$0xff]  ;;  %v1895_v34 = vld [vmem:[%s2666_s25] sm:$0xff] }
 0x703   : > { %v1903_v29 = vunpack.c.l.s8.bf16 %v1897_v27  ;;  %v1902_v31 = vunpack.c.h.s8.bf16 %v1896_v30  ;;  %v1901_v36 = vunpack.c.h.s8.bf16 %v1895_v34 }
 0x704   : > { %v1693_v43 = vrot.slane %v1685_v37, %v1692_v28  ;;  %v1700_v44 = vrot.slane %v1686_v38, %v1692_v28  ;;  %v1709_v45 = vrot.slane %v1701_v39, %v1692_v28  ;;  %v1716_v46 = vrot.slane %v1702_v40, %v1692_v28 }
 0x705   : > { %v1900_v37 = vunpack.c.l.s8.bf16 %v1896_v30  ;;  %v1899_v38 = vunpack.c.l.s8.bf16 %v1895_v34 }
 0x706   : > { %v1721_v48 = vcombine.low %v1693_v43, %v1700_v44  ;;  %v2276_v49 = vcombine.high %v1693_v43, %v1700_v44  ;;  %v1737_v50 = vcombine.low %v1709_v45, %v1716_v46  ;;  %v2277_v51 = vcombine.high %v1709_v45, %v1716_v46  ;;  %v2281_v44 = vld [vmem:[%s2646_s27 + $0x2] ss:$0 sm:$0xff]  ;;  %v2282_v46 = vld [vmem:[%s2646_s27 + $0x3] ss:$0 sm:$0xff] }
 0x708   : > { %v1728_v41 = vrot.slane %v1721_v48, %v1660_v22  ;;  %v1736_v52 = vrot.slane %v2276_v49, %v1660_v22  ;;  %v1744_v53 = vrot.slane %v1737_v50, %v1660_v22  ;;  %v1752_v54 = vrot.slane %v2277_v51, %v1660_v22  ;;  %v2007_v51 = vld [vmem:[%s2676_s14 + $0x38] sm:$0xff] }
 0x709   : > { %v2023_v32 = vunpack.c.h.s8.bf16 %v2007_v51 }
 0x70a   : > { %v1754_v55 = vcombine.high %v1728_v41, %v1736_v52  ;;  %v1770_v56 = vcombine.high %v1744_v53, %v1752_v54  ;;  %v1753_v57 = vcombine.low %v1728_v41, %v1736_v52  ;;  %v1769_v58 = vcombine.low %v1744_v53, %v1752_v54  ;;  %v2003_v41 = vld [vmem:[%s2676_s14 + $0x18] sm:$0xff] }
 0x70b   : > { %v2015_v52 = vunpack.c.h.s8.bf16 %v2003_v41  ;;  %2328 = vmatprep.subr.bf16.mxu1 %v2023_v32  ;;  %v2022_v53 = vunpack.c.l.s8.bf16 %v2007_v51  ;;  %v2014_v54 = vunpack.c.l.s8.bf16 %v2003_v41 }
 0x70c   : > { %v1768_v59 = vrot.slane %v1754_v55, %v1692_v28  ;;  %v1784_v60 = vrot.slane %v1770_v56, %v1692_v28  ;;  %v1761_v61 = vrot.slane %v1753_v57, %v1692_v28  ;;  %v1777_v62 = vrot.slane %v1769_v58, %v1692_v28  ;;  %v2006_v55 = vld [vmem:[%s2676_s14 + $0x30] sm:$0xff] }
 0x70d   : > { %v1904_v28 = vunpack.c.l.s8.bf16 %v1898_v25  ;;  %2329 = vmatpush3.bf16.msra.mxu1 %v2015_v52  ;;  %v2021_v56 = vunpack.c.h.s8.bf16 %v2006_v55  ;;  %v2002_v57 = vld [vmem:[%s2676_s14 + $0x10] sm:$0xff]  ;;  %v2020_v58 = vunpack.c.l.s8.bf16 %v2006_v55 }
 0x70e   : > { %v1787_v63 = vcombine.low %v1768_v59, %v1784_v60  ;;  %v1786_v0 = vcombine.high %v1761_v61, %v1777_v62  ;;  %v1785_v2 = vcombine.low %v1761_v61, %v1777_v62  ;;  %v1788_v47 = vcombine.high %v1768_v59, %v1784_v60  ;;  %2330 = vmatprep.subr.bf16.mxu1 %v2022_v53  ;;  %v2005_v60 = vld [vmem:[%s2676_s14 + $0x28] sm:$0xff] }
 0x70f   : > { %v2013_v59 = vunpack.c.h.s8.bf16 %v2002_v57  ;;  %v2012_v61 = vunpack.c.l.s8.bf16 %v2002_v57  ;;  %v2019_v62 = vunpack.c.h.s8.bf16 %v2005_v60 }
 0x710   : > { %1794 = vrot.lane.b32.xlu0 %v1787_v63, %s2550_s19  ;;  %1790 = vrot.lane.b32.xlu1 %v1786_v0, %s2551_s20  ;;  %v2001_v63 = vld [vmem:[%s2676_s14 + $0x8] sm:$0xff] }
 0x711   : > { %2331 = vmatpush3.bf16.msra.mxu1 %v2014_v54  ;;  %v2011_v0 = vunpack.c.h.s8.bf16 %v2001_v63 }
 0x712   : > { %2332 = vmatprep.subr.bf16.mxu1 %v2021_v56 }
 0x714   : > { %1798 = vrot.lane.b32.xlu1 %v1788_v47, %s2552_s21  ;;  %v2004_v47 = vld [vmem:[%s2676_s14 + $0x20] sm:$0xff] }
 0x715   : > { %2333 = vmatpush3.bf16.msra.mxu1 %v2013_v59 }
 0x716   : > { %2334 = vmatprep.subr.bf16.mxu1 %v2020_v58 }
 0x719   : > { %2335 = vmatpush3.bf16.msra.mxu1 %v2012_v61 }
 0x71a   : > { %2336 = vmatprep.subr.bf16.mxu1 %v2019_v62 }
 0x71d   : > { %2337 = vmatpush3.bf16.msra.mxu1 %v2011_v0 }
 0x782   : > { %v1791_v3 = vpop.permute.xlu1 %1790  ;;  %v1795_v4 = vpop.permute.xlu0 %1794 }
 0x783   : > { %v1801_v5 = vsel %vm721_vm3, %v1785_v2, %v1791_v3  ;;  %v2018_v2 = vunpack.c.l.s8.bf16 %v2005_v60  ;;  %v2010_v3 = vunpack.c.l.s8.bf16 %v2001_v63 }
 0x784   : > { %v1803_v7 = vsel %vm1802_vm8, %v1801_v5, %v1795_v4  ;;  %v2017_v4 = vunpack.c.h.s8.bf16 %v2004_v47  ;;  %v2000_v5 = vld [vmem:[%s2676_s14] sm:$0xff] }
 0x785   : > { %2338 = vmatprep.subr.bf16.mxu1 %v2018_v2 }
 0x786   : > { %v1799_v6 = vpop.permute.xlu1 %1798  ;;  %2339 = vmatpush3.bf16.msra.mxu1 %v2010_v3 }
 0x787   : > { %v1805_v8 = vsel %vm1804_vm9, %v1803_v7, %v1799_v6  ;;  %v2009_v6 = vunpack.c.h.s8.bf16 %v2000_v5  ;;  %2340 = vmatprep.subr.bf16.mxu1 %v2017_v4  ;;  %v2016_v7 = vunpack.c.l.s8.bf16 %v2004_v47 }
 0x788   : > { %v1806_v9 = vpack.c.bf16 %v1805_v8, %v1805_v8  ;;  %v2008_v8 = vunpack.c.l.s8.bf16 %v2000_v5 }
 0x78a   : > { %2407 = vmatmul.mubr.msk.bf16.vlgmr.msra.gmra.mxu0 %vm459_vm1, %v1806_v9  ;;  %2341 = vmatpush3.bf16.msra.mxu1 %v2009_v6  ;;  %v2284_v9 = vld [vmem:[%s2651_s30 + $0x1] ss:$2 sm:$0x3] }
 0x78b   : > { %1942 = vmatprep.mubr.bf16.mxu0 %v2541_v13  ;;  %2342 = vmatprep.subr.bf16.mxu1 %v2016_v7 }
 0x78e   : > { %2343 = vmatpush3.bf16.msra.mxu1 %v2008_v8 }
 0x84a   : > { %v1850_v11 = vpop.f32.mrf.mxu0 }
 0x84b   : > { %v1861_v14 = vmul.f32 %v2279_v10, %v1850_v11  ;;  %v1966_v10 = vld [vmem:[%s2651_s30] ss:$2 sm:$0x3]  ;;  %v1957_v11 = vrot.slane %v2284_v9, %v2698_v33 }
 0x84c   : > { %v2408_v15 = vpop.f32.mrf.mxu0 }
 0x84d   : > { %v1867_v16 = vadd.f32 %v2280_v12, %v1861_v14  ;;  %v1971_v12 = vrot.slane %v1966_v10, %v2698_v33  ;;  %v1961_v14 = vrot.slane %v2284_v9, %v2702_v35 }
 0x84e   : > { %v1853_v17 = vpop.f32.mrf.mxu0 }
 0x84f   : > { %v2792_v18 = vadd.f32 %v1867_v16, %v2680_v1  ;;  %v1905_v1 = vunpack.c.h.s8.bf16 %v1897_v27  ;;  %v1975_v17 = vrot.slane %v1966_v10, %v2702_v35 }
 0x850   : > { %v2409_v19 = vpop.f32.mrf.mxu0 }
 0x851   : > { %v1871_v20 = vsel %vm459_vm1, %v2792_v18, 0.0  ;;  %1919 = vmatpush1.bf16.msra.mxu0 %v1905_v1 }
 0x852   : > { %1872 = vadd.xlane.f32.xlu1 %v1871_v20  ;;  %1920 = vmatprep.subr.bf16.mxu0 %v1904_v28 }
 0x855   : > { %1921 = vmatpush1.bf16.msra.mxu0 %v1903_v29 }
 0x856   : > { %1922 = vmatprep.subr.bf16.mxu0 %v1902_v31 }
 0x859   : > { %1923 = vmatpush1.bf16.msra.mxu0 %v1901_v36 }
 0x85a   : > { %1924 = vmatprep.subr.bf16.mxu0 %v1900_v37 }
 0x85d   : > { %1925 = vmatpush1.bf16.msra.mxu0 %v1899_v38 }
 0x8db   : > { %v1873_v21 = vpop.xlane.xlu1 %1872 }
 0x8dc   : > { %v1874_v13 = vmul.f32 0.015625, %v1873_v21 }
 0x8de   : > { %v1875_v22 = vsub.f32 %v2792_v18, %v1874_v13 }
 0x8e0   : > { %v1876_v23 = vmul.f32 %v1875_v22, %v1875_v22 }
 0x8e2   : > { %v1877_v24 = vsel %vm459_vm1, %v1876_v23, 0.0 }
 0x8e3   : > { %1878 = vadd.xlane.f32.xlu0 %v1877_v24 }
 0x96c   : > { %v1879_v39 = vpop.xlane.xlu0 %1878 }
 0x96d   : > { %v1880_v40 = vmul.f32 0.015625, %v1879_v39 }
 0x96f   : > { %v1881_v42 = vadd.f32 1e-05, %v1880_v40 }
 0x971   : > { %2466 = vrsqrt.f32 %v1881_v42 }
 0x97e   : > { %v2467_v43 = vpop.eup %2466 }
 0x97f   : > { %v1883_v45 = vmul.f32 %v2467_v43, %v1875_v22 }
 0x981   : > { %v1888_v48 = vmul.f32 %v2281_v44, %v1883_v45 }
 0x983   : > { %v1893_v49 = vadd.f32 %v2282_v46, %v1888_v48  ;;  %v2285_v48 = vld [vmem:[%s2646_s27 + $0x7] ss:$0 sm:$0xff] }
 0x985   : > { %v1894_v50 = vpack.c.bf16 %v1893_v49, %v1893_v49 }
 0x987   : > { %2283 = vmatmul.mubr.msk.bf16.vlgmr.msra.gmra.mxu0 %vm459_vm1, %v1894_v50  ;;  %v2286_v50 = vld [vmem:[%s2646_s27 + $0x5] ss:$0 sm:$0xff] }
 0xa47   : > { %v1944_v15 = vpop.f32.mrf.mxu0 }
 0xa48   : > { %v1964_v16 = vmul.f32 %v1957_v11, %v1944_v15 }
 0xa49   : > { %v1946_v19 = vpop.f32.mrf.mxu0 }
 0xa4a   : > { %v1978_v20 = vadd.f32 %v1971_v12, %v1964_v16  ;;  %v1965_v21 = vmul.f32 %v1961_v14, %v1946_v19 }
 0xa4b   : > { %v1948_v13 = vpop.f32.mrf.mxu0 }
 0xa4c   : > { %v1980_v22 = vmul.f32 %v1978_v20, %v1978_v20  ;;  %v1979_v23 = vadd.f32 %v1975_v17, %v1965_v21 }
 0xa4d   : > { %v1949_v24 = vpop.f32.mrf.mxu0 }
 0xa4e   : > { %v1982_v25 = vmul.f32 %v1980_v22, %v1978_v20  ;;  %v1981_v26 = vmul.f32 %v1979_v23, %v1979_v23 }
 0xa50   : > { %v1984_v27 = vmul.f32 0.044715, %v1982_v25  ;;  %v1983_v1 = vmul.f32 %v1981_v26, %v1979_v23 }
 0xa52   : > { %v1986_v28 = vadd.f32 %v1984_v27, %v1978_v20  ;;  %v1985_v29 = vmul.f32 0.044715, %v1983_v1 }
 0xa54   : > { %v1988_v33 = vmul.f32 0.7978846, %v1986_v28  ;;  %v1987_v30 = vadd.f32 %v1985_v29, %v1979_v23 }
 0xa56   : > { %2468 = vtanh.f32 %v1988_v33  ;;  %v1989_v31 = vmul.f32 0.7978846, %v1987_v30 }
 0xa58   : > { %2470 = vtanh.f32 %v1989_v31 }
 0xa63   : > { %v2469_v35 = vpop.eup %2468 }
 0xa64   : > { %v1992_v34 = vadd.f32 1.0, %v2469_v35 }
 0xa65   : > { %v2471_v36 = vpop.eup %2470 }
 0xa66   : > { %v1993_v37 = vadd.f32 1.0, %v2471_v36  ;;  %v1994_v38 = vmul.f32 0.5, %v1992_v34 }
 0xa68   : > { %v1995_v39 = vmul.f32 0.5, %v1993_v37  ;;  %v1996_v40 = vmul.f32 %v1994_v38, %v1978_v20 }
 0xa6a   : > { %v1997_v42 = vmul.f32 %v1995_v39, %v1979_v23  ;;  %v1998_v44 = vpack.c.bf16 %v1996_v40, %v1996_v40 }
 0xa6c   : > { %v1999_v43 = vpack.c.bf16 %v1997_v42, %v1997_v42 }
 0xa6e   : > { %2056 = vmatprep.mubr.bf16.mxu1 %v1999_v43 }
 0xa6f   : > { %2057 = vmatmul.mubr.bf16.vlgmr.msra.gmra.mxu1 %v1998_v44 }
 0xb2f   : > { %v2344_v45 = vpop.f32.mrf.mxu1 }
 0xb31   : > { %v2345_v46 = vpop.f32.mrf.mxu1 }
 0xb32   : > { %v2346_v49 = vadd.f32 %v2345_v46, %v2344_v45 }
 0xb33   : > { %v2347_v51 = vpop.f32.mrf.mxu1 }
 0xb34   : > { %v2069_v32 = vmul.f32 %v2346_v49, %v2285_v48 }
 0xb35   : > { %v2348_v41 = vpop.f32.mrf.mxu1 }
 0xb36   : > { %v2075_v52 = vadd.f32 %v2286_v50, %v2069_v32  ;;  %2081 = sbr.rel (%p2287_p2) target bundleno = 3184 (0xc70), region = 68 }
 0xb38   : > { %v2076_v53 = vadd.f32 %v2075_v52, %v2792_v18 }
 0xb3a   : > { %2077 = vst.msk [vmem:[#allocation7] sm:$0xff] %vm459_vm1, %v2076_v53 }
 0xb3b   : > { %v2084_v54 = vsel %vm459_vm1, %v2076_v53, 0.0  ;;  %v2288_v63 = vld [vmem:[%s2850_s2] ss:$0 sm:$0xff]  ;;  %v2289_v2 = vld [vmem:[%s2850_s2 + $0x1] ss:$0 sm:$0xff] }
 0xb3c   : > { %2085 = vadd.xlane.f32.xlu0 %v2084_v54 }
 0xbc5   : > { %v2086_v55 = vpop.xlane.xlu0 %2085 }
 0xbc6   : > { %v2087_v56 = vmul.f32 0.015625, %v2086_v55 }
 0xbc8   : > { %v2088_v57 = vsub.f32 %v2076_v53, %v2087_v56 }
 0xbca   : > { %v2089_v58 = vmul.f32 %v2088_v57, %v2088_v57 }
 0xbcc   : > { %v2090_v59 = vsel %vm459_vm1, %v2089_v58, 0.0 }
 0xbcd   : > { %2091 = vadd.xlane.f32.xlu0 %v2090_v59 }
 0xc56   : > { %v2092_v60 = vpop.xlane.xlu0 %2091 }
 0xc57   : > { %v2093_v61 = vmul.f32 0.015625, %v2092_v60 }
 0xc59   : > { %v2094_v62 = vadd.f32 1e-05, %v2093_v61 }
 0xc5b   : > { %2472 = vrsqrt.f32 %v2094_v62 }
 0xc68   : > { %v2473_v18 = vpop.eup %2472 }
 0xc69   : > { %v2096_v0 = vmul.f32 %v2473_v18, %v2088_v57 }
 0xc6b   : > { %v2101_v47 = vmul.f32 %v2288_v63, %v2096_v0 }
 0xc6d   : > { %v2106_v3 = vadd.f32 %v2289_v2, %v2101_v47 }
 0xc6f   : > { %2107 = vst.msk [vmem:[#allocation7] sm:$0xff] %vm459_vm1, %v2106_v3 }
 0xc70 PF: > { %p2424_p3 = scmp.eq.s32.totalorder %s2618_s16, 1  ;;  %s2553_s24 = smov [#allocation7]  }
 0xc71   : > { %s2115_s26 = sshll.u32 %s2553_s24, 4  ;;  %s2116_s26 = int_to_ptr.vmem [resolvable:$true] %s2115_s26 }
 0xc72   : > { %s2500_s28 = scalar_lea.vmem %s2116_s26, 128  ;;  %p2507_p7 = scmp.lt.s32.totalorder %s2116_s26, %s2116_s26 }
 0xc73   : > { %p2501_p4 = scmp.ne.s32.totalorder %s2116_s26, %s2500_s28  ;;  %p2508_p8 = scmp.lt.s32.totalorder %s2500_s28, %s2500_s28 }
 0xc75   : > { %p2502_p5 = pnand %p2501_p4, %p2424_p3  ;;  %p2509_p9 = por %p2508_p8, %p2507_p7 }
 0xc77   : > { %p2503_p6 = pneg %p2502_p5 }
 0xc79   : > { %p2510_p10 = pnand %p2509_p9, %p2503_p6 }
 0xc7b   : > { %2513 = shalt.err (!%p2510_p10)
}
 0xc7c   : > { %2415 = dma.vmem_to_hbm [thread:$0]  (%p2424_p3), %s2116_s26, 128, %s2858_s10, [#allocation6]  }
 0xc7d   : > { %2533 = dma.done.wait (%p2424_p3), [#allocation6], 128  }
 0xc7e   : > { %2535 = vsyncadd (%p2424_p3), [#allocation6], 4294967168 }
 0xc7f PF: > { %s23_s15 = sadd.s32 1, %s2538_s15  }
 0xc80   : > { %p20_p11 = scmp.ge.s32.totalorder %s23_s15, 4  }
 0xc82   :  { %22 = sbr.rel (!%p20_p11) target bundleno = 4 (0x4), region = 115 }
 0xc87   :  { %2128 = vsyncpa [#allocation5], 1 }
 0xc88   :  { %2130 = vsyncpa [#allocation5 + $0x1], 1 }
 0xc89   :  { %2131 = vsyncpa [#allocation6], 1 }
 0xc8a   :  { %2133 = vsyncpa [#allocation6 + $0x1], 1 }

// kernel: tpu_custom_call.1
= control target key start
LH: loop header
LB: loop body
LE: loop exit
PB: predicated region body
PF: predicated region fallthrough
CT: control target
= control target key end

     0   :  { %s2762_s0 = inlined_call_operand.<no memory space> [shape: s32[1], index: 0, kind: input, shape index: {}]   ;;  %s2763_s1 = inlined_call_operand.vmem [shape: f32[8,64], index: 1, kind: input, shape index: {}]   ;;  %s2764_s2 = inlined_call_operand.vmem [shape: f32[2,64], index: 2, kind: input, shape index: {}]   ;;  %s2765_s3 = inlined_call_operand.vmem [shape: f32[2,8,64], index: 3, kind: input, shape index: {}]   ;;  %s2766_s4 = inlined_call_operand.vmem [shape: f32[2,2,256], index: 4, kind: input, shape index: {}]   ;;  %s2767_s5 = inlined_call_operand.vmem [shape: f32[2,1,192], index: 5, kind: input, shape index: {}]   ;;  %s2768_s6 = inlined_call_operand.vmem [shape: s8[2,64,192], index: 6, kind: input, shape index: {}]   ;;  %s2769_s7 = inlined_call_operand.vmem [shape: s8[2,64,64], index: 7, kind: input, shape index: {}]   ;;  %s2770_s8 = inlined_call_operand.vmem [shape: s8[2,64,256], index: 8, kind: input, shape index: {}]   ;;  %s2771_s9 = inlined_call_operand.vmem [shape: s8[2,256,64], index: 9, kind: input, shape index: {}]   ;;  %s2772_s10 = inlined_call_operand.hbm [shape: f32[8,64], index: 10, kind: output, shape index: {}]  }
   0x1   :  { %15 = sst [smem:[#allocation3]] %s2762_s0 }
   0x2   :  { %16 = vsyncpa [#allocation5], 0  ;;  %s2543_s15 = smov 0  }
   0x3 LB: > { %s2549_s16 = sadd.s32 4294967295, %s2470_s15   ;;  %p2216_p0 = scmp.ge.s32.totalorder %s2470_s15, 1  ;;  %s2470_s15 = sphi %s2543_s15, %s22_s15  }
   0x4   : > { %p343_p1 = scmp.lt.s32.totalorder %s2470_s15, 3 }
   0x6   : > { %p344_p2 = pnand %p2216_p0, %p343_p1 }
   0x7   : > { %p402_p3 = scmp.lt.s32.totalorder (!%p344_p2), %s2549_s16, 1  ;;  %p2229_p4 = scmp.ne.s32.totalorder (!%p344_p2), %s2549_s16, 0 }
   0x8   : > { %347 = sbr.rel (%p344_p2) target bundleno = 3181 (0xc6d), region = 56 }
   0xd   : > { %s403_s0 = scalar_select %p402_p3, %s2549_s16, 1 }
   0xf   : > { %s2217_s17 = sshll.u32 %s403_s0, 3  ;;  %s2267_s18 = sshll.u32 %s403_s0, 2 }
  0x10   : > { %s2558_s21 = scalar_lea.vmem %s2765_s3, %s2217_s17  ;;  %s2563_s24 = scalar_lea.vmem %s2766_s4, %s2267_s18 }
  0x11   : > { %s2220_s25 = sshll.u32 %s403_s0, 1  ;;  %s2268_s26 = sshll.u32 %s403_s0, 5 }
  0x12   : > { %s2568_s29 = scalar_lea.vmem %s2767_s5, %s2220_s25  ;;  %s2573_s12 = scalar_lea.vmem %s2768_s6, %s2268_s26 }
  0x13   : > { %s2269_s13 = sshll.u32 %s403_s0, 4  ;;  %s2578_s19 = scalar_lea.vmem %s2770_s8, %s2268_s26 }
  0x14   : > { %s2583_s22 = scalar_lea.vmem %s2769_s7, %s2269_s13  ;;  %s2271_s23 = sshll.u32 %s403_s0, 6 }
  0x15   : > { %s2588_s28 = scalar_lea.vmem %s2771_s9, %s2271_s23  ;;  %439 = sbr.rel (%p2229_p4) target bundleno = 28 (0x1c), region = 60 }
  0x1a   : > { %v440_v0 = vld [vmem:[%s2763_s1] sm:$0xff]  ;;  %vm441_vm0 = vcmask 523264  }
  0x1b   : > { %442 = vst.msk [vmem:[#allocation4] sm:$0xff] %vm441_vm0, %v440_v0 }
  0x1c PF: > { %vm446_vm1 = vcmask 523264   ;;  %v475_v8 = vld [vmem:[%s2573_s12 + $0x18] sm:$0xff]  ;;  %v474_v9 = vld [vmem:[%s2573_s12 + $0x10] sm:$0xff]  ;;  %v2472_v13 = vmov 0   ;;  %v473_v14 = vld [vmem:[%s2573_s12 + $0x8] sm:$0xff]  ;;  %v530_v31 = vlaneseq  ;;  %s2473_s0 = smov 80  }
  0x1d   : > { %v481_v10 = vunpack.c.l.s8.bf16 %v475_v8  ;;  %v483_v11 = vunpack.c.h.s8.bf16 %v475_v8  ;;  %v482_v12 = vunpack.c.h.s8.bf16 %v474_v9  ;;  %519 = vmatprep.mubr.bf16.mxu0 %v2472_v13  ;;  %v480_v15 = vunpack.c.l.s8.bf16 %v474_v9  ;;  %v472_v17 = vld [vmem:[%s2573_s12] sm:$0xff]  ;;  %s2474_s26 = smov 112   ;;  %s2476_s12 = smov 64  }
  0x1e   : > { %v479_v16 = vunpack.c.h.s8.bf16 %v473_v14  ;;  %v478_v18 = vunpack.c.h.s8.bf16 %v472_v17  ;;  %v477_v19 = vunpack.c.l.s8.bf16 %v473_v14  ;;  %v476_v20 = vunpack.c.l.s8.bf16 %v472_v17  ;;  %v2230_v25 = vld [vmem:[%s2558_s21] ss:$0 sm:$0xff]  ;;  %v2231_v27 = vld [vmem:[%s2558_s21 + $0x1] ss:$0 sm:$0xff]  ;;  %s564_s13 = sld [smem:[#allocation3]]  ;;  %s2481_s14 = smov 32  }
  0x1f   : > { %495 = vmatprep.subr.bf16.mxu0 %v483_v11  ;;  %v2609_v32 = vshrl.u32 %v530_v31, 7  ;;  %v528_v34 = vld [vmem:[%s2568_s29] sm:$0x3]  ;;  %s2475_s29 = smov 96   ;;  %v2477_v47 = vmov 0.0   ;;  %vm2478_vm2 = vmmov 0  }
  0x20   : > { %496 = vmatpush1.bf16.msra.mxu0 %v482_v12  ;;  %2323 = vmatprep.subr.mxu1 %v2477_v47  ;;  %vm708_vm3 = vcmask 130048   ;;  %v562_v60 = vand.u32 127, %v530_v31  ;;  %vm1003_vm7 = vcmask 64512   ;;  %s2482_s17 = smov 16   ;;  %s2483_s18 = smov 48   ;;  %vm1789_vm8 = vcmask 261120  }
  0x21   : > { %497 = vmatprep.subr.bf16.mxu0 %v481_v10  ;;  %v2612_v33 = vsub.s32 0, %v2609_v32  ;;  %v2616_v35 = vsub.s32 1, %v2609_v32  ;;  %2327 = vmatprep.mubr.msk.f32.mxu1 %vm2478_vm2, %v2477_v47  ;;  %vm1791_vm9 = vcmask 392192   ;;  %p2260_p5 = scmp.ne.s32.totalorder %s2549_s16, 1 }
  0x22   : > { %v2594_v1 = vld [vmem:[#allocation4] sm:$0xff]  ;;  %vm563_vm4 = vcmp.le.s32.totalorder %v562_v60, %v2609_v32 }
  0x23   : > { %v447_v2 = vsel %vm446_vm1, %v2594_v1, 0.0  ;;  %v533_v36 = vrot.slane %v528_v34, %v2612_v33  ;;  %v537_v37 = vrot.slane %v528_v34, %v2616_v35 }
  0x24   : > { %448 = vadd.xlane.f32.xlu0 %v447_v2  ;;  %498 = vmatpush1.bf16.msra.mxu0 %v480_v15  ;;  %v565_v61 = vstv %s564_s13 }
  0x25   : > { %499 = vmatprep.subr.bf16.mxu0 %v479_v16  ;;  %vm566_vm5 = vcmp.lt.s32.totalorder %v562_v60, %v565_v61 }
  0x26   : > { %vm2647_vm6 = vmand %vm563_vm4, %vm566_vm5 }
  0x28   : > { %500 = vmatpush1.bf16.msra.mxu0 %v478_v18 }
  0x29   : > { %501 = vmatprep.subr.bf16.mxu0 %v477_v19 }
  0x2c   : > { %502 = vmatpush1.bf16.msra.mxu0 %v476_v20 }
  0xad   : > { %v449_v3 = vpop.xlane.xlu0 %448 }
  0xae   : > { %v451_v4 = vmul.f32 0.015625, %v449_v3 }
  0xb0   : > { %v452_v5 = vsub.f32 %v2594_v1, %v451_v4 }
  0xb2   : > { %v453_v6 = vmul.f32 %v452_v5, %v452_v5 }
  0xb4   : > { %v454_v7 = vsel %vm446_vm1, %v453_v6, 0.0 }
  0xb5   : > { %455 = vadd.xlane.f32.xlu0 %v454_v7 }
 0x13e   : > { %v456_v21 = vpop.xlane.xlu0 %455 }
 0x13f   : > { %v457_v22 = vmul.f32 0.015625, %v456_v21 }
 0x141   : > { %v458_v23 = vadd.f32 1e-05, %v457_v22 }
 0x143   : > { %2410 = vrsqrt.f32 %v458_v23 }
 0x150   : > { %v2411_v24 = vpop.eup %2410 }
 0x151   : > { %v460_v26 = vmul.f32 %v2411_v24, %v452_v5 }
 0x153   : > { %v465_v28 = vmul.f32 %v2230_v25, %v460_v26 }
 0x155   : > { %v470_v29 = vadd.f32 %v2231_v27, %v465_v28 }
 0x157   : > { %v471_v30 = vpack.c.bf16 %v470_v29, %v470_v29 }
 0x159   : > { %2232 = vmatmul.mubr.msk.bf16.vlgmr.msra.gmra.mxu0 %vm446_vm1, %v471_v30 }
 0x219   : > { %v521_v38 = vpop.f32.mrf.mxu0 }
 0x21a   : > { %v540_v39 = vmul.f32 %v533_v36, %v521_v38 }
 0x21b   : > { %v523_v40 = vpop.f32.mrf.mxu0 }
 0x21c   : > { %v2620_v41 = vmul.f32 %v537_v37, %v523_v40  ;;  %547 = vrot.lane.b32.xlu0 %v540_v39, %s2473_s0  ;;  %543 = vrot.lane.b32.xlu1 %v540_v39, %s2474_s26 }
 0x21d   : > { %v525_v42 = vpop.f32.mrf.mxu0 }
 0x21f   : > { %v526_v43 = vpop.f32.mrf.mxu0 }
 0x220   : > { %545 = vrot.lane.b32.xlu1 %v540_v39, %s2475_s29 }
 0x224   : > { %568 = vrot.lane.b32.xlu1 %v540_v39, %s2476_s12 }
 0x28e   : > { %v544_v44 = vpop.permute.xlu1 %543  ;;  %v548_v46 = vpop.permute.xlu0 %547 }
 0x28f   : > { %570 = vrot.lane.b32.xlu1 %v544_v44, %s2476_s12 }
 0x292   : > { %v546_v45 = vpop.permute.xlu1 %545 }
 0x293   : > { %572 = vrot.lane.b32.xlu1 %v546_v45, %s2476_s12 }
 0x296   : > { %v569_v48 = vpop.permute.xlu1 %568 }
 0x297   : > { %574 = vrot.lane.b32.xlu1 %v548_v46, %s2476_s12 }
 0x2c0   : > { %580 = vxpose.xlu1.b32.start.end [1/1] (short) (narrow) %v569_v48, 16 }
 0x301   : > { %v571_v49 = vpop.permute.xlu1 %570 }
 0x302   : > { %612 = vxpose.xlu0.b32.start.end [1/1] (short) (narrow) %v571_v49, 16 }
 0x305   : > { %v573_v50 = vpop.permute.xlu1 %572 }
 0x307   : > { %644 = vxpose.xlu0.b32.start.end [1/1] (short) (narrow) %v573_v50, 16 }
 0x309   : > { %v575_v51 = vpop.permute.xlu1 %574 }
 0x30c   : > { %676 = vxpose.xlu0.b32.start.end [1/1] (short) (narrow) %v575_v51, 16 }
 0x33c   : > { %v596_v52 = vpop.trf.xlu1 }
 0x340   : > { %v597_v53 = vpop.trf.xlu1 }
 0x341   : > { %2324 = vmatpush3.msra.mxu1 %v597_v53 }
 0x342   : > { %2325 = vmatprep.subr.mxu1 %v2477_v47 }
 0x343   : > { %2326 = vmatpush3.msra.mxu1 %v596_v52 }
 0x344   : > { %2328 = vmatmul.mubr.msk.f32.vlgmr.msra.gmra.mxu1 %vm708_vm3, %v540_v39  ;;  %2330 = vmatprep.subr.mxu1 %v2477_v47 }
 0x345   : > { %2334 = vmatprep.mubr.msk.f32.mxu1 %vm2478_vm2, %v2477_v47 }
 0x37e   : > { %v628_v54 = vpop.trf.xlu0 }
 0x382   : > { %v629_v55 = vpop.trf.xlu0 }
 0x383   : > { %2331 = vmatpush3.msra.mxu1 %v629_v55 }
 0x384   : > { %2332 = vmatprep.subr.mxu1 %v2477_v47 }
 0x385   : > { %2333 = vmatpush3.msra.mxu1 %v628_v54 }
 0x386   : > { %v660_v56 = vpop.trf.xlu0  ;;  %2335 = vmatmul.mubr.msk.f32.vlgmr.msra.gmra.mxu1 %vm708_vm3, %v544_v44  ;;  %2337 = vmatprep.subr.mxu1 %v2477_v47 }
 0x387   : > { %2341 = vmatprep.mubr.msk.f32.mxu1 %vm2478_vm2, %v2477_v47 }
 0x38a   : > { %v661_v57 = vpop.trf.xlu0 }
 0x38b   : > { %2338 = vmatpush3.msra.mxu1 %v661_v57 }
 0x38c   : > { %2339 = vmatprep.subr.mxu1 %v2477_v47 }
 0x38d   : > { %2340 = vmatpush3.msra.mxu1 %v660_v56 }
 0x38e   : > { %v692_v58 = vpop.trf.xlu0  ;;  %2342 = vmatmul.mubr.msk.f32.vlgmr.msra.gmra.mxu1 %vm708_vm3, %v546_v45  ;;  %2344 = vmatprep.subr.mxu1 %v2477_v47 }
 0x38f   : > { %2348 = vmatprep.mubr.msk.f32.mxu1 %vm2478_vm2, %v2477_v47 }
 0x392   : > { %v693_v59 = vpop.trf.xlu0 }
 0x393   : > { %2345 = vmatpush3.msra.mxu1 %v693_v59 }
 0x394   : > { %2346 = vmatprep.subr.mxu1 %v2477_v47 }
 0x395   : > { %2347 = vmatpush3.msra.mxu1 %v692_v58 }
 0x396   : > { %2349 = vmatmul.mubr.msk.f32.vlgmr.msra.gmra.mxu1 %vm708_vm3, %v548_v46 }
 0x404   : > { %v777_v63 = vpop.f32.mrf.mxu1 }
 0x405   : > { %v999_v0 = vsel %vm2647_vm6, %v777_v63, -3.4028235e+38 }
 0x406   : > { %v2329_v2 = vpop.f32.mrf.mxu1  ;;  %v1004_v3 = vsel %vm1003_vm7, %v999_v0, -inf }
 0x407   : > { %1005 = vmax.xlane.f32.xlu1 %v1004_v3 }
 0x446   : > { %v849_v4 = vpop.f32.mrf.mxu1 }
 0x447   : > { %v1000_v5 = vsel %vm2647_vm6, %v849_v4, -3.4028235e+38 }
 0x448   : > { %v2336_v6 = vpop.f32.mrf.mxu1  ;;  %v1007_v7 = vsel %vm1003_vm7, %v1000_v5, -inf }
 0x449   : > { %1008 = vmax.xlane.f32.xlu0 %v1007_v7 }
 0x44e   : > { %v921_v8 = vpop.f32.mrf.mxu1 }
 0x44f   : > { %v1001_v9 = vsel %vm2647_vm6, %v921_v8, -3.4028235e+38 }
 0x450   : > { %v2343_v10 = vpop.f32.mrf.mxu1  ;;  %v1010_v11 = vsel %vm1003_vm7, %v1001_v9, -inf }
 0x451   : > { %1011 = vmax.xlane.f32.xlu1 %v1010_v11 }
 0x456   : > { %v993_v12 = vpop.f32.mrf.mxu1 }
 0x457   : > { %v1002_v14 = vsel %vm2647_vm6, %v993_v12, -3.4028235e+38  ;;  %v2479_v12 = vmov 1983009808  }
 0x458   : > { %v2350_v15 = vpop.f32.mrf.mxu1  ;;  %v1013_v16 = vsel %vm1003_vm7, %v1002_v14, -inf }
 0x459   : > { %1014 = vmax.xlane.f32.xlu1 %v1013_v16  ;;  %v2480_v16 = vmov 1934713408  }
 0x45f   : > { %553 = vrot.lane.b32.xlu0 %v2620_v41, %s2475_s29 }
 0x46a   : > { %550 = vrot.lane.b32.xlu1 %v2620_v41, %s2474_s26 }
 0x46e   : > { %556 = vrot.lane.b32.xlu1 %v2620_v41, %s2473_s0 }
 0x490   : > { %v1006_v17 = vpop.xlane.xlu1 %1005 }
 0x491   : > { %v1016_v18 = vsub.f32 %v999_v0, %v1006_v17  ;;  %v1675_v17 = vunpack.c.l.s4 %v2480_v16 }
 0x493   : > { %v1020_v19 = vmul.f32 1.442695, %v1016_v18 }
 0x495   : > { %2412 = vpow2.f32 %v1020_v19 }
 0x4a2   : > { %v2413_v20 = vpop.eup %2412 }
 0x4a3   : > { %v1028_v21 = vsel %vm1003_vm7, %v2413_v20, 0.0 }
 0x4a4   : > { %1029 = vadd.xlane.f32.xlu0 %v1028_v21 }
 0x4d2   : > { %v1009_v22 = vpop.xlane.xlu0 %1008 }
 0x4d3   : > { %v1017_v23 = vsub.f32 %v1000_v5, %v1009_v22 }
 0x4d5   : > { %v1022_v24 = vmul.f32 1.442695, %v1017_v23 }
 0x4d6   : > { %v554_v42 = vpop.permute.xlu0 %553 }
 0x4d7   : > { %2414 = vpow2.f32 %v1022_v24 }
 0x4da   : > { %v1012_v25 = vpop.xlane.xlu1 %1011 }
 0x4db   : > { %v1018_v26 = vsub.f32 %v1001_v9, %v1012_v25  ;;  %v1795_v9 = vld [vmem:[%s2583_s22 + $0x8] sm:$0xff] }
 0x4dc   : > { %v1799_v10 = vunpack.c.h.s8.bf16 %v1795_v9  ;;  %v1798_v11 = vunpack.c.l.s8.bf16 %v1795_v9 }
 0x4dd   : > { %v1024_v27 = vmul.f32 1.442695, %v1018_v26 }
 0x4df   : > { %2416 = vpow2.f32 %v1024_v27 }
 0x4e2   : > { %v1015_v28 = vpop.xlane.xlu1 %1014 }
 0x4e3   : > { %v1019_v29 = vsub.f32 %v1002_v14, %v1015_v28  ;;  %v1643_v14 = vunpack.c.l.s4 %v2479_v12  ;;  %v2253_v12 = vld [vmem:[%s2558_s21 + $0x4] ss:$0 sm:$0xff] }
 0x4e4   : > { %v2415_v30 = vpop.eup %2414 }
 0x4e5   : > { %v1026_v31 = vmul.f32 1.442695, %v1019_v29  ;;  %v1031_v34 = vsel %vm1003_vm7, %v2415_v30, 0.0  ;;  %v1644_v19 = vunpack.c.0.s8 %v1643_v14 }
 0x4e6   : > { %1032 = vadd.xlane.f32.xlu0 %v1031_v34  ;;  %v551_v40 = vpop.permute.xlu1 %550 }
 0x4e7   : > { %2418 = vpow2.f32 %v1026_v31  ;;  %v1647_v22 = vsub.s32 %v1644_v19, %v2609_v32 }
 0x4ea   : > { %v557_v43 = vpop.permute.xlu1 %556 }
 0x4ec   : > { %v2417_v36 = vpop.eup %2416 }
 0x4ed   : > { %v1034_v37 = vsel %vm1003_vm7, %v2417_v36, 0.0 }
 0x4ee   : > { %1035 = vadd.xlane.f32.xlu1 %v1034_v37 }
 0x4f4   : > { %v2419_v38 = vpop.eup %2418 }
 0x4f5   : > { %v1037_v39 = vsel %vm1003_vm7, %v2419_v38, 0.0 }
 0x4f6   : > { %1038 = vadd.xlane.f32.xlu0 %v1037_v39 }
 0x521   : > { %1048 = vxpose.xlu1.b32.start.end [1/1] (short) (narrow) %v2620_v41, 16 }
 0x523   : > { %1080 = vxpose.xlu0.b32.start.end [1/1] (short) (narrow) %v551_v40, 16 }
 0x526   : > { %1112 = vxpose.xlu1.b32.start.end [1/1] (short) (narrow) %v554_v42, 16 }
 0x528   : > { %1144 = vxpose.xlu0.b32.start.end [1/1] (short) (narrow) %v557_v43, 16 }
 0x52d   : > { %v1030_v44 = vpop.xlane.xlu0 %1029 }
 0x52e   : > { %2420 = vrcp.f32 %v1030_v44 }
 0x53b   : > { %v2421_v45 = vpop.eup %2420 }
 0x53c   : > { %v1044_v46 = vmul.f32 %v2421_v45, %v2413_v20  ;;  %v1676_v20 = vunpack.c.0.s8 %v1675_v17 }
 0x53e   : > { %2351 = vmatprep.subr.msk.mxu1 %vm1003_vm7, %v1044_v46  ;;  %v1679_v28 = vsub.s32 %v1676_v20, %v2609_v32 }
 0x53f   : > { %2352 = vmatpush3.xpose.msk.msra.mxu1 %vm1003_vm7, %v1044_v46 }
 0x56f   : > { %v1033_v48 = vpop.xlane.xlu0 %1032 }
 0x570   : > { %2422 = vrcp.f32 %v1033_v48 }
 0x577   : > { %v1036_v49 = vpop.xlane.xlu1 %1035 }
 0x578   : > { %2424 = vrcp.f32 %v1036_v49 }
 0x57d   : > { %v2423_v50 = vpop.eup %2422 }
 0x57e   : > { %v1045_v51 = vmul.f32 %v2423_v50, %v2415_v30 }
 0x57f   : > { %v1039_v41 = vpop.xlane.xlu0 %1038 }
 0x580   : > { %2426 = vrcp.f32 %v1039_v41  ;;  %2356 = vmatprep.subr.msk.mxu0 %vm1003_vm7, %v1045_v51 }
 0x581   : > { %2357 = vmatpush3.xpose.msk.msra.mxu0 %vm1003_vm7, %v1045_v51 }
 0x585   : > { %v2425_v52 = vpop.eup %2424 }
 0x586   : > { %v1046_v53 = vmul.f32 %v2425_v52, %v2417_v36  ;;  %v1794_v36 = vld [vmem:[%s2583_s22] sm:$0xff] }
 0x587   : > { %v1797_v42 = vunpack.c.h.s8.bf16 %v1794_v36  ;;  %v1796_v32 = vunpack.c.l.s8.bf16 %v1794_v36 }
 0x588   : > { %2361 = vmatprep.subr.msk.mxu1 %vm1003_vm7, %v1046_v53 }
 0x58d   : > { %v2427_v54 = vpop.eup %2426 }
 0x58e   : > { %v1047_v55 = vmul.f32 %v2427_v54, %v2419_v38 }
 0x590   : > { %2366 = vmatprep.subr.msk.mxu0 %vm1003_vm7, %v1047_v55 }
 0x59d   : > { %v1064_v56 = vpop.trf.xlu1 }
 0x59e   : > { %2353 = vmatprep.mubr.msk.f32.mxu1 %vm1003_vm7, %v1064_v56 }
 0x59f   : > { %v1096_v57 = vpop.trf.xlu0 }
 0x5a0   : > { %2358 = vmatprep.mubr.msk.f32.mxu0 %vm1003_vm7, %v1096_v57 }
 0x5a1   : > { %v1065_v58 = vpop.trf.xlu1 }
 0x5a2   : > { %2354 = vmatmul.mubr.msk.f32.vlgmr.msra.gmra.mxu1 %vm1003_vm7, %v1065_v58 }
 0x5a3   : > { %2362 = vmatpush3.xpose.msk.msra.mxu1 %vm1003_vm7, %v1046_v53  ;;  %v1097_v59 = vpop.trf.xlu0 }
 0x5a4   : > { %2359 = vmatmul.mubr.msk.f32.vlgmr.msra.gmra.mxu0 %vm1003_vm7, %v1097_v59 }
 0x5a5   : > { %2367 = vmatpush3.xpose.msk.msra.mxu0 %vm1003_vm7, %v1047_v55  ;;  %v1128_v60 = vpop.trf.xlu1 }
 0x5a6   : > { %2363 = vmatprep.mubr.msk.f32.mxu1 %vm1003_vm7, %v1128_v60  ;;  %2371 = vmatprep.subr.bf16.mxu0 %v2477_v47 }
 0x5a7   : > { %v1160_v61 = vpop.trf.xlu0 }
 0x5a8   : > { %2368 = vmatprep.mubr.msk.f32.mxu0 %vm1003_vm7, %v1160_v61 }
 0x5a9   : > { %v1129_v62 = vpop.trf.xlu1 }
 0x5aa   : > { %2364 = vmatmul.mubr.msk.f32.vlgmr.msra.gmra.mxu1 %vm1003_vm7, %v1129_v62 }
 0x5ab   : > { %v1161_v63 = vpop.trf.xlu0 }
 0x5ac   : > { %2369 = vmatmul.mubr.msk.f32.vlgmr.msra.gmra.mxu0 %vm1003_vm7, %v1161_v63 }
 0x5ad   : > { %2379 = vmatprep.mubr.msk.bf16.mxu0 %vm2478_vm2, %v2477_v47  ;;  %2372 = vmatpush3.bf16.msra.mxu0 %v1799_v10  ;;  %v2252_v10 = vld [vmem:[%s2558_s21 + $0x6] ss:$0 sm:$0xff] }
 0x5ae   : > { %2373 = vmatprep.subr.bf16.mxu0 %v2477_v47 }
 0x5b1   : > { %2374 = vmatpush3.bf16.msra.mxu0 %v1798_v11 }
 0x5b2   : > { %2375 = vmatprep.subr.bf16.mxu0 %v2477_v47 }
 0x5b5   : > { %2376 = vmatpush3.bf16.msra.mxu0 %v1797_v42 }
 0x5b6   : > { %2377 = vmatprep.subr.bf16.mxu0 %v2477_v47 }
 0x5b9   : > { %2378 = vmatpush3.bf16.msra.mxu0 %v1796_v32 }
 0x662   : > { %v2355_v0 = vpop.f32.mrf.mxu1 }
 0x664   : > { %v1251_v2 = vpop.f32.mrf.mxu1  ;;  %v2360_v3 = vpop.f32.mrf.mxu0 }
 0x665   : > { %1512 = vxpose.xlu1.b32.start [1/2] (short) (narrow) %v1251_v2, 8 }
 0x666   : > { %v1335_v4 = vpop.f32.mrf.mxu0 }
 0x667   : > { %1544 = vxpose.xlu0.b32.start [1/2] (short) (narrow) %v1335_v4, 8 }
 0x669   : > { %1513 = vxpose.xlu1.b32.end [2/2] (short) (narrow) %v2355_v0, 8 }
 0x66a   : > { %v2365_v5 = vpop.f32.mrf.mxu1 }
 0x66b   : > { %1545 = vxpose.xlu0.b32.end [2/2] (short) (narrow) %v2360_v3, 8 }
 0x66c   : > { %v1419_v6 = vpop.f32.mrf.mxu1  ;;  %v2370_v7 = vpop.f32.mrf.mxu0 }
 0x66d   : > { %1576 = vxpose.xlu1.b32.start [1/2] (short) (narrow) %v1419_v6, 8 }
 0x66e   : > { %v1503_v8 = vpop.f32.mrf.mxu0 }
 0x66f   : > { %1608 = vxpose.xlu0.b32.start [1/2] (short) (narrow) %v1503_v8, 8 }
 0x671   : > { %1577 = vxpose.xlu1.b32.end [2/2] (short) (narrow) %v2365_v5, 8 }
 0x673   : > { %1609 = vxpose.xlu0.b32.end [2/2] (short) (narrow) %v2370_v7, 8 }
 0x6e1   : > { %v1528_v15 = vpop.trf.xlu1 }
 0x6e3   : > { %v1560_v18 = vpop.trf.xlu0 }
 0x6e9   : > { %v1592_v21 = vpop.trf.xlu1 }
 0x6ea   : > { %v1640_v23 = vcombine.low %v1528_v15, %v1592_v21  ;;  %v1641_v24 = vcombine.high %v1528_v15, %v1592_v21 }
 0x6eb   : > { %v1624_v25 = vpop.trf.xlu0 }
 0x6ec   : > { %v1656_v26 = vcombine.low %v1560_v18, %v1624_v25  ;;  %v1657_v27 = vcombine.high %v1560_v18, %v1624_v25  ;;  %v1648_v29 = vrot.slane %v1640_v23, %v1647_v22  ;;  %v1655_v30 = vrot.slane %v1641_v24, %v1647_v22  ;;  %v1885_v25 = vld [vmem:[%s2578_s19 + $0x18] sm:$0xff] }
 0x6ee   : > { %v1664_v31 = vrot.slane %v1656_v26, %v1647_v22  ;;  %v1671_v34 = vrot.slane %v1657_v27, %v1647_v22  ;;  %v1893_v26 = vunpack.c.h.s8.bf16 %v1885_v25  ;;  %v1884_v27 = vld [vmem:[%s2578_s19 + $0x10] sm:$0xff] }
 0x6f0   : > { %v1672_v37 = vcombine.low %v1648_v29, %v1664_v31  ;;  %v1673_v38 = vcombine.high %v1648_v29, %v1664_v31  ;;  %v1688_v39 = vcombine.low %v1655_v30, %v1671_v34  ;;  %v1689_v40 = vcombine.high %v1655_v30, %v1671_v34  ;;  %1905 = vmatprep.subr.bf16.mxu0 %v1893_v26  ;;  %v1883_v30 = vld [vmem:[%s2578_s19 + $0x8] sm:$0xff]  ;;  %v1882_v34 = vld [vmem:[%s2578_s19] sm:$0xff] }
 0x6f1   : > { %v1890_v29 = vunpack.c.l.s8.bf16 %v1884_v27  ;;  %v1889_v31 = vunpack.c.h.s8.bf16 %v1883_v30  ;;  %v1888_v36 = vunpack.c.h.s8.bf16 %v1882_v34 }
 0x6f2   : > { %v1680_v43 = vrot.slane %v1672_v37, %v1679_v28  ;;  %v1687_v44 = vrot.slane %v1673_v38, %v1679_v28  ;;  %v1696_v45 = vrot.slane %v1688_v39, %v1679_v28  ;;  %v1703_v46 = vrot.slane %v1689_v40, %v1679_v28 }
 0x6f3   : > { %v1887_v37 = vunpack.c.l.s8.bf16 %v1883_v30  ;;  %v1886_v38 = vunpack.c.l.s8.bf16 %v1882_v34 }
 0x6f4   : > { %v1708_v48 = vcombine.low %v1680_v43, %v1687_v44  ;;  %v2249_v49 = vcombine.high %v1680_v43, %v1687_v44  ;;  %v1724_v50 = vcombine.low %v1696_v45, %v1703_v46  ;;  %v2250_v51 = vcombine.high %v1696_v45, %v1703_v46  ;;  %v2254_v44 = vld [vmem:[%s2558_s21 + $0x2] ss:$0 sm:$0xff]  ;;  %v2255_v46 = vld [vmem:[%s2558_s21 + $0x3] ss:$0 sm:$0xff] }
 0x6f6   : > { %v1715_v41 = vrot.slane %v1708_v48, %v1647_v22  ;;  %v1723_v52 = vrot.slane %v2249_v49, %v1647_v22  ;;  %v1731_v53 = vrot.slane %v1724_v50, %v1647_v22  ;;  %v1739_v54 = vrot.slane %v2250_v51, %v1647_v22  ;;  %v1994_v51 = vld [vmem:[%s2588_s28 + $0x38] sm:$0xff] }
 0x6f7   : > { %v2010_v32 = vunpack.c.h.s8.bf16 %v1994_v51 }
 0x6f8   : > { %v1741_v55 = vcombine.high %v1715_v41, %v1723_v52  ;;  %v1757_v56 = vcombine.high %v1731_v53, %v1739_v54  ;;  %v1740_v57 = vcombine.low %v1715_v41, %v1723_v52  ;;  %v1756_v58 = vcombine.low %v1731_v53, %v1739_v54  ;;  %v1990_v41 = vld [vmem:[%s2588_s28 + $0x18] sm:$0xff] }
 0x6f9   : > { %v2002_v52 = vunpack.c.h.s8.bf16 %v1990_v41  ;;  %2301 = vmatprep.subr.bf16.mxu1 %v2010_v32  ;;  %v2009_v53 = vunpack.c.l.s8.bf16 %v1994_v51  ;;  %v2001_v54 = vunpack.c.l.s8.bf16 %v1990_v41 }
 0x6fa   : > { %v1755_v59 = vrot.slane %v1741_v55, %v1679_v28  ;;  %v1771_v60 = vrot.slane %v1757_v56, %v1679_v28  ;;  %v1748_v61 = vrot.slane %v1740_v57, %v1679_v28  ;;  %v1764_v62 = vrot.slane %v1756_v58, %v1679_v28  ;;  %v1993_v55 = vld [vmem:[%s2588_s28 + $0x30] sm:$0xff] }
 0x6fb   : > { %v1891_v28 = vunpack.c.l.s8.bf16 %v1885_v25  ;;  %2302 = vmatpush3.bf16.msra.mxu1 %v2002_v52  ;;  %v2008_v56 = vunpack.c.h.s8.bf16 %v1993_v55  ;;  %v1989_v57 = vld [vmem:[%s2588_s28 + $0x10] sm:$0xff]  ;;  %v2007_v58 = vunpack.c.l.s8.bf16 %v1993_v55 }
 0x6fc   : > { %v1774_v63 = vcombine.low %v1755_v59, %v1771_v60  ;;  %v1773_v0 = vcombine.high %v1748_v61, %v1764_v62  ;;  %v1772_v2 = vcombine.low %v1748_v61, %v1764_v62  ;;  %v1775_v47 = vcombine.high %v1755_v59, %v1771_v60  ;;  %2303 = vmatprep.subr.bf16.mxu1 %v2009_v53  ;;  %v1992_v60 = vld [vmem:[%s2588_s28 + $0x28] sm:$0xff] }
 0x6fd   : > { %v2000_v59 = vunpack.c.h.s8.bf16 %v1989_v57  ;;  %v1999_v61 = vunpack.c.l.s8.bf16 %v1989_v57  ;;  %v2006_v62 = vunpack.c.h.s8.bf16 %v1992_v60 }
 0x6fe   : > { %1781 = vrot.lane.b32.xlu0 %v1774_v63, %s2481_s14  ;;  %1777 = vrot.lane.b32.xlu1 %v1773_v0, %s2482_s17  ;;  %v1988_v63 = vld [vmem:[%s2588_s28 + $0x8] sm:$0xff] }
 0x6ff   : > { %2304 = vmatpush3.bf16.msra.mxu1 %v2001_v54  ;;  %v1998_v0 = vunpack.c.h.s8.bf16 %v1988_v63 }
 0x700   : > { %2305 = vmatprep.subr.bf16.mxu1 %v2008_v56 }
 0x702   : > { %1785 = vrot.lane.b32.xlu1 %v1775_v47, %s2483_s18  ;;  %v1991_v47 = vld [vmem:[%s2588_s28 + $0x20] sm:$0xff] }
 0x703   : > { %2306 = vmatpush3.bf16.msra.mxu1 %v2000_v59 }
 0x704   : > { %2307 = vmatprep.subr.bf16.mxu1 %v2007_v58 }
 0x707   : > { %2308 = vmatpush3.bf16.msra.mxu1 %v1999_v61 }
 0x708   : > { %2309 = vmatprep.subr.bf16.mxu1 %v2006_v62 }
 0x70b   : > { %2310 = vmatpush3.bf16.msra.mxu1 %v1998_v0 }
 0x770   : > { %v1778_v3 = vpop.permute.xlu1 %1777  ;;  %v1782_v4 = vpop.permute.xlu0 %1781 }
 0x771   : > { %v1788_v5 = vsel %vm708_vm3, %v1772_v2, %v1778_v3  ;;  %v2005_v2 = vunpack.c.l.s8.bf16 %v1992_v60  ;;  %v1997_v3 = vunpack.c.l.s8.bf16 %v1988_v63 }
 0x772   : > { %v1790_v7 = vsel %vm1789_vm8, %v1788_v5, %v1782_v4  ;;  %v2004_v4 = vunpack.c.h.s8.bf16 %v1991_v47  ;;  %v1987_v5 = vld [vmem:[%s2588_s28] sm:$0xff] }
 0x773   : > { %2311 = vmatprep.subr.bf16.mxu1 %v2005_v2 }
 0x774   : > { %v1786_v6 = vpop.permute.xlu1 %1785  ;;  %2312 = vmatpush3.bf16.msra.mxu1 %v1997_v3 }
 0x775   : > { %v1792_v8 = vsel %vm1791_vm9, %v1790_v7, %v1786_v6  ;;  %v1996_v6 = vunpack.c.h.s8.bf16 %v1987_v5  ;;  %2313 = vmatprep.subr.bf16.mxu1 %v2004_v4  ;;  %v2003_v7 = vunpack.c.l.s8.bf16 %v1991_v47 }
 0x776   : > { %v1793_v9 = vpack.c.bf16 %v1792_v8, %v1792_v8  ;;  %v1995_v8 = vunpack.c.l.s8.bf16 %v1987_v5 }
 0x778   : > { %2380 = vmatmul.mubr.msk.bf16.vlgmr.msra.gmra.mxu0 %vm446_vm1, %v1793_v9  ;;  %2314 = vmatpush3.bf16.msra.mxu1 %v1996_v6  ;;  %v2257_v9 = vld [vmem:[%s2563_s24 + $0x1] ss:$2 sm:$0x3] }
 0x779   : > { %1929 = vmatprep.mubr.bf16.mxu0 %v2472_v13  ;;  %2315 = vmatprep.subr.bf16.mxu1 %v2003_v7 }
 0x77c   : > { %2316 = vmatpush3.bf16.msra.mxu1 %v1995_v8 }
 0x838   : > { %v1837_v11 = vpop.f32.mrf.mxu0 }
 0x839   : > { %v1848_v14 = vmul.f32 %v2252_v10, %v1837_v11  ;;  %v1953_v10 = vld [vmem:[%s2563_s24] ss:$2 sm:$0x3]  ;;  %v1944_v11 = vrot.slane %v2257_v9, %v2612_v33 }
 0x83a   : > { %v2381_v15 = vpop.f32.mrf.mxu0 }
 0x83b   : > { %v1854_v16 = vadd.f32 %v2253_v12, %v1848_v14  ;;  %v1958_v12 = vrot.slane %v1953_v10, %v2612_v33  ;;  %v1948_v14 = vrot.slane %v2257_v9, %v2616_v35 }
 0x83c   : > { %v1840_v17 = vpop.f32.mrf.mxu0 }
 0x83d   : > { %v2706_v18 = vadd.f32 %v1854_v16, %v2594_v1  ;;  %v1892_v1 = vunpack.c.h.s8.bf16 %v1884_v27  ;;  %v1962_v17 = vrot.slane %v1953_v10, %v2616_v35 }
 0x83e   : > { %v2382_v19 = vpop.f32.mrf.mxu0 }
 0x83f   : > { %v1858_v20 = vsel %vm446_vm1, %v2706_v18, 0.0  ;;  %1906 = vmatpush1.bf16.msra.mxu0 %v1892_v1 }
 0x840   : > { %1859 = vadd.xlane.f32.xlu1 %v1858_v20  ;;  %1907 = vmatprep.subr.bf16.mxu0 %v1891_v28 }
 0x843   : > { %1908 = vmatpush1.bf16.msra.mxu0 %v1890_v29 }
 0x844   : > { %1909 = vmatprep.subr.bf16.mxu0 %v1889_v31 }
 0x847   : > { %1910 = vmatpush1.bf16.msra.mxu0 %v1888_v36 }
 0x848   : > { %1911 = vmatprep.subr.bf16.mxu0 %v1887_v37 }
 0x84b   : > { %1912 = vmatpush1.bf16.msra.mxu0 %v1886_v38 }
 0x8c9   : > { %v1860_v21 = vpop.xlane.xlu1 %1859 }
 0x8ca   : > { %v1861_v13 = vmul.f32 0.015625, %v1860_v21 }
 0x8cc   : > { %v1862_v22 = vsub.f32 %v2706_v18, %v1861_v13 }
 0x8ce   : > { %v1863_v23 = vmul.f32 %v1862_v22, %v1862_v22 }
 0x8d0   : > { %v1864_v24 = vsel %vm446_vm1, %v1863_v23, 0.0 }
 0x8d1   : > { %1865 = vadd.xlane.f32.xlu0 %v1864_v24 }
 0x95a   : > { %v1866_v39 = vpop.xlane.xlu0 %1865 }
 0x95b   : > { %v1867_v40 = vmul.f32 0.015625, %v1866_v39 }
 0x95d   : > { %v1868_v42 = vadd.f32 1e-05, %v1867_v40 }
 0x95f   : > { %2428 = vrsqrt.f32 %v1868_v42 }
 0x96c   : > { %v2429_v43 = vpop.eup %2428 }
 0x96d   : > { %v1870_v45 = vmul.f32 %v2429_v43, %v1862_v22 }
 0x96f   : > { %v1875_v48 = vmul.f32 %v2254_v44, %v1870_v45 }
 0x971   : > { %v1880_v49 = vadd.f32 %v2255_v46, %v1875_v48  ;;  %v2258_v48 = vld [vmem:[%s2558_s21 + $0x7] ss:$0 sm:$0xff] }
 0x973   : > { %v1881_v50 = vpack.c.bf16 %v1880_v49, %v1880_v49 }
 0x975   : > { %2256 = vmatmul.mubr.msk.bf16.vlgmr.msra.gmra.mxu0 %vm446_vm1, %v1881_v50  ;;  %v2259_v50 = vld [vmem:[%s2558_s21 + $0x5] ss:$0 sm:$0xff] }
 0xa35   : > { %v1931_v15 = vpop.f32.mrf.mxu0 }
 0xa36   : > { %v1951_v16 = vmul.f32 %v1944_v11, %v1931_v15 }
 0xa37   : > { %v1933_v19 = vpop.f32.mrf.mxu0 }
 0xa38   : > { %v1965_v20 = vadd.f32 %v1958_v12, %v1951_v16  ;;  %v1952_v21 = vmul.f32 %v1948_v14, %v1933_v19 }
 0xa39   : > { %v1935_v13 = vpop.f32.mrf.mxu0 }
 0xa3a   : > { %v1967_v22 = vmul.f32 %v1965_v20, %v1965_v20  ;;  %v1966_v23 = vadd.f32 %v1962_v17, %v1952_v21 }
 0xa3b   : > { %v1936_v24 = vpop.f32.mrf.mxu0 }
 0xa3c   : > { %v1969_v25 = vmul.f32 %v1967_v22, %v1965_v20  ;;  %v1968_v26 = vmul.f32 %v1966_v23, %v1966_v23 }
 0xa3e   : > { %v1971_v27 = vmul.f32 0.044715, %v1969_v25  ;;  %v1970_v1 = vmul.f32 %v1968_v26, %v1966_v23 }
 0xa40   : > { %v1973_v28 = vadd.f32 %v1971_v27, %v1965_v20  ;;  %v1972_v29 = vmul.f32 0.044715, %v1970_v1 }
 0xa42   : > { %v1975_v33 = vmul.f32 0.7978846, %v1973_v28  ;;  %v1974_v30 = vadd.f32 %v1972_v29, %v1966_v23 }
 0xa44   : > { %2430 = vtanh.f32 %v1975_v33  ;;  %v1976_v31 = vmul.f32 0.7978846, %v1974_v30 }
 0xa46   : > { %2432 = vtanh.f32 %v1976_v31 }
 0xa51   : > { %v2431_v35 = vpop.eup %2430 }
 0xa52   : > { %v1979_v34 = vadd.f32 1.0, %v2431_v35 }
 0xa53   : > { %v2433_v36 = vpop.eup %2432 }
 0xa54   : > { %v1980_v37 = vadd.f32 1.0, %v2433_v36  ;;  %v1981_v38 = vmul.f32 0.5, %v1979_v34 }
 0xa56   : > { %v1982_v39 = vmul.f32 0.5, %v1980_v37  ;;  %v1983_v40 = vmul.f32 %v1981_v38, %v1965_v20 }
 0xa58   : > { %v1984_v42 = vmul.f32 %v1982_v39, %v1966_v23  ;;  %v1985_v44 = vpack.c.bf16 %v1983_v40, %v1983_v40 }
 0xa5a   : > { %v1986_v43 = vpack.c.bf16 %v1984_v42, %v1984_v42 }
 0xa5c   : > { %2043 = vmatprep.mubr.bf16.mxu1 %v1986_v43 }
 0xa5d   : > { %2044 = vmatmul.mubr.bf16.vlgmr.msra.gmra.mxu1 %v1985_v44 }
 0xb1d   : > { %v2317_v45 = vpop.f32.mrf.mxu1 }
 0xb1f   : > { %v2318_v46 = vpop.f32.mrf.mxu1 }
 0xb20   : > { %v2319_v49 = vadd.f32 %v2318_v46, %v2317_v45 }
 0xb21   : > { %v2320_v51 = vpop.f32.mrf.mxu1 }
 0xb22   : > { %v2056_v32 = vmul.f32 %v2319_v49, %v2258_v48 }
 0xb23   : > { %v2321_v41 = vpop.f32.mrf.mxu1 }
 0xb24   : > { %v2062_v52 = vadd.f32 %v2259_v50, %v2056_v32  ;;  %2068 = sbr.rel (%p2260_p5) target bundleno = 3166 (0xc5e), region = 64 }
 0xb26   : > { %v2063_v53 = vadd.f32 %v2062_v52, %v2706_v18 }
 0xb28   : > { %2064 = vst.msk [vmem:[#allocation4] sm:$0xff] %vm446_vm1, %v2063_v53 }
 0xb29   : > { %v2071_v54 = vsel %vm446_vm1, %v2063_v53, 0.0  ;;  %v2261_v63 = vld [vmem:[%s2764_s2] ss:$0 sm:$0xff]  ;;  %v2262_v2 = vld [vmem:[%s2764_s2 + $0x1] ss:$0 sm:$0xff] }
 0xb2a   : > { %2072 = vadd.xlane.f32.xlu0 %v2071_v54 }
 0xbb3   : > { %v2073_v55 = vpop.xlane.xlu0 %2072 }
 0xbb4   : > { %v2074_v56 = vmul.f32 0.015625, %v2073_v55 }
 0xbb6   : > { %v2075_v57 = vsub.f32 %v2063_v53, %v2074_v56 }
 0xbb8   : > { %v2076_v58 = vmul.f32 %v2075_v57, %v2075_v57 }
 0xbba   : > { %v2077_v59 = vsel %vm446_vm1, %v2076_v58, 0.0 }
 0xbbb   : > { %2078 = vadd.xlane.f32.xlu0 %v2077_v59 }
 0xc44   : > { %v2079_v60 = vpop.xlane.xlu0 %2078 }
 0xc45   : > { %v2080_v61 = vmul.f32 0.015625, %v2079_v60 }
 0xc47   : > { %v2081_v62 = vadd.f32 1e-05, %v2080_v61 }
 0xc49   : > { %2434 = vrsqrt.f32 %v2081_v62 }
 0xc56   : > { %v2435_v18 = vpop.eup %2434 }
 0xc57   : > { %v2083_v0 = vmul.f32 %v2435_v18, %v2075_v57 }
 0xc59   : > { %v2088_v47 = vmul.f32 %v2261_v63, %v2083_v0 }
 0xc5b   : > { %v2093_v3 = vadd.f32 %v2262_v2, %v2088_v47 }
 0xc5d   : > { %2094 = vst.msk [vmem:[#allocation4] sm:$0xff] %vm446_vm1, %v2093_v3 }
 0xc5e PF: > { %p2387_p6 = scmp.eq.s32.totalorder %s2549_s16, 1  ;;  %s2484_s22 = smov [#allocation4]  }
 0xc5f   : > { %s2102_s23 = sshll.u32 %s2484_s22, 4  ;;  %s2103_s23 = int_to_ptr.vmem [resolvable:$true] %s2102_s23 }
 0xc60   : > { %s2436_s27 = scalar_lea.vmem %s2103_s23, 128  ;;  %p2443_p10 = scmp.lt.s32.totalorder %s2103_s23, %s2103_s23 }
 0xc61   : > { %p2437_p7 = scmp.ne.s32.totalorder %s2103_s23, %s2436_s27  ;;  %p2444_p11 = scmp.lt.s32.totalorder %s2436_s27, %s2436_s27 }
 0xc63   : > { %p2438_p8 = pnand %p2437_p7, %p2387_p6  ;;  %p2445_p12 = por %p2444_p11, %p2443_p10 }
 0xc65   : > { %p2439_p9 = pneg %p2438_p8 }
 0xc67   : > { %p2446_p13 = pnand %p2445_p12, %p2439_p9 }
 0xc69   : > { %2449 = shalt.err (!%p2446_p13)
}
 0xc6a   : > { %2384 = dma.vmem_to_hbm [thread:$0]  (%p2387_p6), %s2103_s23, 128, %s2772_s10, [#allocation5]  }
 0xc6b   : > { %2465 = dma.done.wait (%p2387_p6), [#allocation5], 128  }
 0xc6c   : > { %2467 = vsyncadd (%p2387_p6), [#allocation5], 4294967168 }
 0xc6d PF: > { %s22_s15 = sadd.s32 1, %s2470_s15  }
 0xc6e   : > { %p19_p0 = scmp.ge.s32.totalorder %s22_s15, 4  }
 0xc70   :  { %21 = sbr.rel (!%p19_p0) target bundleno = 3 (0x3), region = 110 }
 0xc75   :  { %2115 = vsyncpa [#allocation5], 1 }
 0xc76   :  { %2117 = vsyncpa [#allocation5 + $0x1], 1 }

</bundles_post_ra>
